<compile_context>
chip_gen: v6e
topology: v6e:2x2x1
jax: 0.10.0
libtpu: 0.0.40
codegen_flags: <defaults>
</compile_context>

<pallas_src>
import functools
import math

import numpy as np
import jax
import jax.numpy as jnp
from jax.experimental import pallas as pl
from jax.experimental.pallas import tpu as pltpu

# MXU input precision for matmuls (projections, FFN, embedding conv, in-layer
# decomp).  bf16 inputs + f32 accumulation; set to jnp.float32 for bit-exact
# parity with the PyTorch f32 module.
MXU_DTYPE = jnp.bfloat16

_VMEM_LIMIT_BYTES = 48 * 1024 * 1024   # > v5e/v6e/v7x scoped defaults, < v7x 64MiB physical


def _cparams():
    return pltpu.CompilerParams(dimension_semantics=("parallel",),
                                vmem_limit_bytes=_VMEM_LIMIT_BYTES)


def _pick_bm(M, cap=256):
    """Row-tile size: >=2 grid steps whenever possible (v7x's second TensorCore
    only helps if the 'parallel' grid has >=2 iterations), multiple of 8
    (sublane), capped.  Sweep cap to 512-1024 on v6e (128 MiB VMEM)."""
    if M <= 8:
        return M
    half = -(-M // 2)
    bm = ((half + 7) // 8) * 8
    return min(bm, cap)


def _activate(x, act):
    if act == "relu":
        return jnp.maximum(x, 0.0)
    if act == "gelu":
        return jax.nn.gelu(x, approximate=False)   # exact erf GELU (PyTorch default)
    return x


# ----------------------------------------------------------------------------
# Pallas kernels
# ----------------------------------------------------------------------------

def _linear_kernel(x_ref, w_ref, b_ref, o_ref):
    o_ref[...] = (jnp.dot(x_ref[...], w_ref[...],
                          preferred_element_type=jnp.float32) + b_ref[...])


def pallas_linear(x2d, w, b=None, block_m=256):
    """(M,K)@(K,N) + bias; bf16 streaming inputs, f32 accumulation/output."""
    M, K = x2d.shape
    N = w.shape[1]
    bm = _pick_bm(M, block_m)
    bias = (jnp.zeros((1, N), jnp.float32) if b is None
            else jnp.asarray(b, jnp.float32).reshape(1, N))
    return pl.pallas_call(
        _linear_kernel,
        out_shape=jax.ShapeDtypeStruct((M, N), jnp.float32),
        grid=(pl.cdiv(M, bm),),
        in_specs=[pl.BlockSpec((bm, K), lambda i: (i, 0)),
                  pl.BlockSpec((K, N), lambda i: (0, 0)),
                  pl.BlockSpec((1, N), lambda i: (0, 0))],
        out_specs=pl.BlockSpec((bm, N), lambda i: (i, 0)),
        compiler_params=_cparams(),
    )(x2d.astype(MXU_DTYPE), w.astype(MXU_DTYPE), bias)


def _attn_out_decomp_kernel(*refs, want_trend):
    """out_proj(attn) + bias + residual -> series_decomp, all in one VMEM pass."""
    if want_trend:
        a_ref, w_ref, b_ref, r_ref, A_ref, s_ref, t_ref = refs
    else:
        a_ref, w_ref, b_ref, r_ref, A_ref, s_ref = refs
        t_ref = None
    y = jnp.dot(a_ref[0], w_ref[...], preferred_element_type=jnp.float32)
    y = y + b_ref[...] + r_ref[0]                                     # fused residual
    trend = jnp.dot(A_ref[...], y.astype(MXU_DTYPE),
                    preferred_element_type=jnp.float32)               # moving average
    s_ref[0] = y - trend
    if want_trend:
        t_ref[0] = trend


def pallas_outproj_residual_decomp(attn, w, b, residual, A, want_trend):
    B, L, D = residual.shape
    sspec = pl.BlockSpec((1, L, D), lambda i: (i, 0, 0))
    if want_trend:
        out_shape = (jax.ShapeDtypeStruct((B, L, D), jnp.float32),
                     jax.ShapeDtypeStruct((B, L, D), jnp.float32))
        out_specs = (sspec, sspec)
    else:
        out_shape = jax.ShapeDtypeStruct((B, L, D), jnp.float32)
        out_specs = sspec
    res = pl.pallas_call(
        functools.partial(_attn_out_decomp_kernel, want_trend=want_trend),
        out_shape=out_shape,
        grid=(B,),
        in_specs=[pl.BlockSpec((1, L, D), lambda i: (i, 0, 0)),   # attn (bf16 stream)
                  pl.BlockSpec((D, D), lambda i: (0, 0)),
                  pl.BlockSpec((1, D), lambda i: (0, 0)),
                  pl.BlockSpec((1, L, D), lambda i: (i, 0, 0)),   # residual (f32 stream)
                  pl.BlockSpec((L, L), lambda i: (0, 0))],        # moving-avg matrix
        out_specs=out_specs,
        compiler_params=_cparams(),
    )(attn.astype(MXU_DTYPE), w.astype(MXU_DTYPE),
      jnp.asarray(b, jnp.float32).reshape(1, D),
      residual.astype(jnp.float32), A.astype(MXU_DTYPE))
    if want_trend:
        return res[0], res[1]
    return res, None


def _ffn_decomp_kernel(*refs, act, want_trend):
    """conv1(k=1) + act + conv2(k=1) + residual -> series_decomp, in one pass."""
    if want_trend:
        x_ref, w1_ref, w2_ref, A_ref, s_ref, t_ref = refs
    else:
        x_ref, w1_ref, w2_ref, A_ref, s_ref = refs
        t_ref = None
    x = x_ref[0]                                                      # (L, D) f32
    h = jnp.dot(x.astype(MXU_DTYPE), w1_ref[...],
                preferred_element_type=jnp.float32)
    h = _activate(h, act).astype(MXU_DTYPE)        # bf16 intermediate (half the spill)
    y = x + jnp.dot(h, w2_ref[...], preferred_element_type=jnp.float32)
    trend = jnp.dot(A_ref[...], y.astype(MXU_DTYPE),
                    preferred_element_type=jnp.float32)
    s_ref[0] = y - trend
    if want_trend:
        t_ref[0] = trend


def pallas_ffn_residual_decomp(x, w1, w2, A, act, want_trend):
    B, L, D = x.shape
    dff = w1.shape[1]
    sspec = pl.BlockSpec((1, L, D), lambda i: (i, 0, 0))
    if want_trend:
        out_shape = (jax.ShapeDtypeStruct((B, L, D), jnp.float32),
                     jax.ShapeDtypeStruct((B, L, D), jnp.float32))
        out_specs = (sspec, sspec)
    else:
        out_shape = jax.ShapeDtypeStruct((B, L, D), jnp.float32)
        out_specs = sspec
    res = pl.pallas_call(
        functools.partial(_ffn_decomp_kernel, act=act, want_trend=want_trend),
        out_shape=out_shape,
        grid=(B,),
        in_specs=[pl.BlockSpec((1, L, D), lambda i: (i, 0, 0)),
                  pl.BlockSpec((D, dff), lambda i: (0, 0)),
                  pl.BlockSpec((dff, D), lambda i: (0, 0)),
                  pl.BlockSpec((L, L), lambda i: (0, 0))],
        out_specs=out_specs,
        compiler_params=_cparams(),
    )(x.astype(jnp.float32), w1.astype(MXU_DTYPE), w2.astype(MXU_DTYPE),
      A.astype(MXU_DTYPE))
    if want_trend:
        return res[0], res[1]
    return res, None


def _decomp_kernel(a_ref, x_ref, s_ref, t_ref):
    x = x_ref[0]                                                      # (L, D) f32
    trend = jnp.dot(a_ref[...], x, preferred_element_type=jnp.float32)
    t_ref[0] = trend
    s_ref[0] = x - trend


def pallas_series_decomp(x, A):
    """Standalone series_decomp (f32) — only used once, on the raw encoder input."""
    B, L, D = x.shape
    sspec = pl.BlockSpec((1, L, D), lambda b: (b, 0, 0))
    seasonal, trend = pl.pallas_call(
        _decomp_kernel,
        out_shape=(jax.ShapeDtypeStruct((B, L, D), jnp.float32),
                   jax.ShapeDtypeStruct((B, L, D), jnp.float32)),
        grid=(B,),
        in_specs=[pl.BlockSpec((L, L), lambda b: (0, 0)), sspec],
        out_specs=(sspec, sspec),
        compiler_params=_cparams(),
    )(A.astype(jnp.float32), x.astype(jnp.float32))
    return seasonal, trend


def _my_layernorm_kernel(x_ref, g_ref, b_ref, o_ref):
    x = x_ref[...]                                                    # (bb, L, D)
    mu = jnp.mean(x, axis=-1, keepdims=True)
    var = jnp.mean(jnp.square(x - mu), axis=-1, keepdims=True)
    xhat = (x - mu) * jax.lax.rsqrt(var + 1e-5) * g_ref[...] + b_ref[...]
    o_ref[...] = xhat - jnp.mean(xhat, axis=1, keepdims=True)


def pallas_my_layernorm(x, gamma, beta):
    """my_Layernorm: LayerNorm over channels then subtract per-series time mean."""
    B, L, D = x.shape
    bb = max(1, min(4, -(-B // 2)))    # >=2 grid steps (v7x), capped for 64MiB VMEM
    return pl.pallas_call(
        _my_layernorm_kernel,
        out_shape=jax.ShapeDtypeStruct((B, L, D), jnp.float32),
        grid=(pl.cdiv(B, bb),),
        in_specs=[pl.BlockSpec((bb, L, D), lambda i: (i, 0, 0)),
                  pl.BlockSpec((1, 1, D), lambda i: (0, 0, 0)),
                  pl.BlockSpec((1, 1, D), lambda i: (0, 0, 0))],
        out_specs=pl.BlockSpec((bb, L, D), lambda i: (i, 0, 0)),
        compiler_params=_cparams(),
    )(x.astype(jnp.float32),
      gamma.reshape(1, 1, D).astype(jnp.float32),
      beta.reshape(1, 1, D).astype(jnp.float32))


def _ln_proj_trend_kernel(x_ref, g_ref, b_ref, w_ref, pb_ref, tr_ref, o_ref):
    """my_Layernorm + Linear(d_model->c_out, bias) + trend add, fused per batch."""
    x = x_ref[0]                                                      # (L, D) f32
    mu = jnp.mean(x, axis=-1, keepdims=True)
    var = jnp.mean(jnp.square(x - mu), axis=-1, keepdims=True)
    xhat = (x - mu) * jax.lax.rsqrt(var + 1e-5) * g_ref[0] + b_ref[0]
    xhat = xhat - jnp.mean(xhat, axis=0, keepdims=True)               # time-mean removal
    y = jnp.dot(xhat.astype(MXU_DTYPE), w_ref[...],
                preferred_element_type=jnp.float32)
    o_ref[0] = y + pb_ref[0] + tr_ref[0]                              # + bias + trend


def pallas_ln_proj_trend(x, gamma, beta, w, b, trend):
    B, L, D = x.shape
    C = w.shape[1]
    return pl.pallas_call(
        _ln_proj_trend_kernel,
        out_shape=jax.ShapeDtypeStruct((B, L, C), jnp.float32),
        grid=(B,),
        in_specs=[pl.BlockSpec((1, L, D), lambda i: (i, 0, 0)),
                  pl.BlockSpec((1, D), lambda i: (0, 0)),
                  pl.BlockSpec((1, D), lambda i: (0, 0)),
                  pl.BlockSpec((D, C), lambda i: (0, 0)),
                  pl.BlockSpec((1, C), lambda i: (0, 0)),
                  pl.BlockSpec((1, L, C), lambda i: (i, 0, 0))],
        out_specs=pl.BlockSpec((1, L, C), lambda i: (i, 0, 0)),
        compiler_params=_cparams(),
    )(x.astype(jnp.float32),
      gamma.reshape(1, D).astype(jnp.float32),
      beta.reshape(1, D).astype(jnp.float32),
      w.astype(MXU_DTYPE),
      jnp.asarray(b, jnp.float32).reshape(1, C),
      trend.astype(jnp.float32))


# ----------------------------------------------------------------------------
# Model glue (XLA only where no clean Pallas equivalent exists: FFT, top-k)
# ----------------------------------------------------------------------------

def build_moving_avg_matrix(L, kernel_size):
    """A[t,s] such that trend = A @ x reproduces AvgPool1d with replicate ends."""
    p = (kernel_size - 1) // 2
    src = np.clip(np.arange(L)[:, None] - p + np.arange(kernel_size)[None, :], 0, L - 1)
    A = np.zeros((L, L), dtype=np.float32)
    np.add.at(A, (np.repeat(np.arange(L), kernel_size), src.ravel()), 1.0 / kernel_size)
    # TODO(synk): A is banded (moving_avg nonzeros/row); a sliding-window/cumsum
    # VPU form would cut the decomp FLOPs by ~L/k at very long pred_len.
    return jnp.asarray(A)


def _roll_stack_k3(x):
    """(B,L,C) -> (B,L,3C) with channels [x_{t-1}, x_t, x_{t+1}] (circular), so a
    Conv1d(k=3, padding=1, padding_mode='circular') is one lane-dense matmul."""
    return jnp.concatenate([jnp.roll(x, 1, axis=1), x, jnp.roll(x, -1, axis=1)], axis=-1)


def data_embedding_wo_pos(p, x, x_mark):
    """TokenEmbedding (circular conv k=3, no bias) + TimeFeatureEmbedding (Linear,
    no bias) fused into one matmul kernel.  Dropout = identity (eval)."""
    B, L, _ = x.shape
    xs = _roll_stack_k3(x)
    if x_mark is None:
        y = pallas_linear(xs.reshape(B * L, -1), p["token_w"])
    else:
        xs = jnp.concatenate([xs, x_mark], axis=-1)
        y = pallas_linear(xs.reshape(B * L, -1), p["emb_w"])
    return y.reshape(B, L, -1)


def trend_projection(trend, w):
    """Decoder trend Conv1d(d_model -> c_out, k=3, circular, no bias)."""
    B, L, _ = trend.shape
    xs = _roll_stack_k3(trend)
    return pallas_linear(xs.reshape(B * L, xs.shape[-1]), w).reshape(B, L, -1)


def time_delay_agg_inference(values, corr, factor):
    """values, corr: (B,H,E,L) -> (B,H,E,L).  fori_loop over the top-k delays,
    accumulating weighted circular gathers (no (B,K,H,E,L) intermediate)."""
    B, H, E, L = values.shape
    top_k = max(1, int(factor * math.log(L)))
    mean_value = jnp.mean(corr, axis=(1, 2))                          # (B, L)
    weights, delay = jax.lax.top_k(mean_value, top_k)                 # (B, K)
    tmp_corr = jax.nn.softmax(weights, axis=-1)                       # (B, K)
    init_index = jnp.arange(L, dtype=jnp.int32)

    def body(k, acc):
        d = jax.lax.dynamic_slice_in_dim(delay, k, 1, axis=1)         # (B, 1)
        w = jax.lax.dynamic_slice_in_dim(tmp_corr, k, 1, axis=1)      # (B, 1)
        idx = (init_index[None, :] + d) % L                           # (B, L) circular
        pattern = jnp.take_along_axis(values, idx[:, None, None, :], axis=-1)
        return acc + pattern * w[:, :, None, None]

    return jax.lax.fori_loop(0, top_k, body, jnp.zeros_like(values))


def auto_correlation(queries, keys, values, factor):
    """AutoCorrelation.forward (eval). q: (B,L,H,E); k,v: (B,S,H,E) -> (B,L,H,E)."""
    B, L, H, E = queries.shape
    S = keys.shape[1]
    if L > S:
        pad = jnp.zeros((B, L - S, H, E), queries.dtype)
        keys = jnp.concatenate([keys, pad], axis=1)
        values = jnp.concatenate([values, pad], axis=1)
    else:
        keys = keys[:, :L]
        values = values[:, :L]
    qp = jnp.transpose(queries, (0, 2, 3, 1))
    kp = jnp.transpose(keys, (0, 2, 3, 1))
    vp = jnp.transpose(values, (0, 2, 3, 1))
    # TODO(synk): FFT has no Pallas primitive; autocorrelation scoring uses XLA FFT.
    q_fft = jnp.fft.rfft(qp, axis=-1)
    k_fft = jnp.fft.rfft(kp, axis=-1)
    corr = jnp.fft.irfft(q_fft * jnp.conj(k_fft), n=L, axis=-1)       # (B,H,E,L)
    V = time_delay_agg_inference(vp, corr, factor)                    # (B,H,E,L)
    return jnp.transpose(V, (0, 3, 1, 2))                             # (B,L,H,E)


def self_attention_block(p, x, A, n_heads, factor, want_trend):
    """Fused QKV -> autocorrelation -> (out-proj + residual + decomp) kernel."""
    B, L, D = x.shape
    qkv = pallas_linear(x.reshape(B * L, D), p["wqkv"], p["bqkv"])    # one (D,3D) matmul
    q, k, v = jnp.split(qkv, 3, axis=-1)
    q = q.reshape(B, L, n_heads, -1)
    k = k.reshape(B, L, n_heads, -1)
    v = v.reshape(B, L, n_heads, -1)
    attn = auto_correlation(q, k, v, factor).reshape(B, L, D)
    return pallas_outproj_residual_decomp(attn, p["wo"], p["bo"], x, A, want_trend)


def cross_attention_block(p, x, cross, A, n_heads, factor):
    B, L, D = x.shape
    S = cross.shape[1]
    q = pallas_linear(x.reshape(B * L, D), p["wq"], p["bq"])
    kv = pallas_linear(cross.reshape(B * S, D), p["wkv"], p["bkv"])   # fused K/V
    k, v = jnp.split(kv, 2, axis=-1)
    q = q.reshape(B, L, n_heads, -1)
    k = k.reshape(B, S, n_heads, -1)
    v = v.reshape(B, S, n_heads, -1)
    attn = auto_correlation(q, k, v, factor).reshape(B, L, D)
    return pallas_outproj_residual_decomp(attn, p["wo"], p["bo"], x, A,
                                          want_trend=True)


def encoder_layer(p, x, A, cfg):
    x, _ = self_attention_block(p["attn"], x, A, cfg["n_heads"], cfg["factor"],
                                want_trend=False)
    x, _ = pallas_ffn_residual_decomp(x, p["conv1_w"], p["conv2_w"], A,
                                      cfg["activation"], want_trend=False)
    return x


def decoder_layer(p, x, cross, A, cfg):
    x, trend1 = self_attention_block(p["self_attn"], x, A, cfg["n_heads"],
                                     cfg["factor"], want_trend=True)
    x, trend2 = cross_attention_block(p["cross_attn"], x, cross, A,
                                      cfg["n_heads"], cfg["factor"])
    x, trend3 = pallas_ffn_residual_decomp(x, p["conv1_w"], p["conv2_w"], A,
                                           cfg["activation"], want_trend=True)
    residual_trend = trend1 + trend2 + trend3
    residual_trend = trend_projection(residual_trend, p["trend_w"])   # (B, L, c_out)
    return x, residual_trend


def autoformer_forward(params, x_enc, x_mark_enc, x_dec, x_mark_dec,
                       A_enc, A_dec, cfg):
    # ---- forecast() decomposition / inits ----
    mean = jnp.mean(x_enc, axis=1, keepdims=True)
    mean = jnp.tile(mean, (1, cfg["pred_len"], 1))
    zeros = jnp.zeros((x_dec.shape[0], cfg["pred_len"], x_dec.shape[2]), x_enc.dtype)
    seasonal_init, trend_init = pallas_series_decomp(x_enc, A_enc)
    trend_init = jnp.concatenate([trend_init[:, -cfg["label_len"]:, :], mean], axis=1)
    seasonal_init = jnp.concatenate([seasonal_init[:, -cfg["label_len"]:, :], zeros],
                                    axis=1)

    # ---- encoder ----
    enc_out = data_embedding_wo_pos(params["enc_emb"], x_enc, x_mark_enc)
    for lp in params["enc_layers"]:
        enc_out = encoder_layer(lp, enc_out, A_enc, cfg)
    enc_out = pallas_my_layernorm(enc_out, params["enc_norm"]["gamma"],
                                  params["enc_norm"]["beta"])

    # ---- decoder ----
    x = data_embedding_wo_pos(params["dec_emb"], seasonal_init, x_mark_dec)
    trend = trend_init
    for lp in params["dec_layers"]:
        x, residual_trend = decoder_layer(lp, x, enc_out, A_dec, cfg)
        trend = trend + residual_trend
    # fused my_Layernorm + Linear(d_model -> c_out) + (trend + seasonal) add
    dec_out = pallas_ln_proj_trend(x, params["dec_norm"]["gamma"],
                                   params["dec_norm"]["beta"],
                                   params["dec_proj"]["w"], params["dec_proj"]["b"],
                                   trend)
    return dec_out[:, -cfg["pred_len"]:, :]


# ----------------------------------------------------------------------------
# Deterministic parameter construction
#
# Weights use the (in, out) / (k*in, out) convention — nn.Linear (out,in) and
# Conv1d (out,in,k) PyTorch weights must be transposed / reshaped into this
# layout when loading a real checkpoint.  Fused QKV / KV / embedding weights are
# concatenated once here (not per forward step) and stored in MXU_DTYPE.
# ----------------------------------------------------------------------------

def init_params(key, cfg):
    keys = iter(jax.random.split(key, 512))

    def nxt(shape, scale=0.05):
        return scale * jax.random.normal(next(keys), shape, jnp.float32)

    D, dff = cfg["d_model"], cfg["d_ff"]
    MD = MXU_DTYPE

    def self_attn_params():
        wq, wk, wv = nxt((D, D)), nxt((D, D)), nxt((D, D))
        bq, bk, bv = nxt((D,), 0.01), nxt((D,), 0.01), nxt((D,), 0.01)
        return dict(wqkv=jnp.concatenate([wq, wk, wv], axis=1).astype(MD),
                    bqkv=jnp.concatenate([bq, bk, bv]),
                    wo=nxt((D, D)).astype(MD), bo=nxt((D,), 0.01))

    def cross_attn_params():
        wk, wv = nxt((D, D)), nxt((D, D))
        bk, bv = nxt((D,), 0.01), nxt((D,), 0.01)
        return dict(wq=nxt((D, D)).astype(MD), bq=nxt((D,), 0.01),
                    wkv=jnp.concatenate([wk, wv], axis=1).astype(MD),
                    bkv=jnp.concatenate([bk, bv]),
                    wo=nxt((D, D)).astype(MD), bo=nxt((D,), 0.01))

    def emb_params(cin):
        token_w = nxt((3 * cin, D))            # Conv1d(cin, D, k=3) -> (3*cin, D)
        time_w = nxt((cfg["mark_dim"], D))     # TimeFeatureEmbedding Linear (no bias)
        return dict(token_w=token_w.astype(MD),
                    emb_w=jnp.concatenate([token_w, time_w], axis=0).astype(MD))

    params = {
        "enc_emb": emb_params(cfg["enc_in"]),
        "dec_emb": emb_params(cfg["dec_in"]),
        "enc_layers": [dict(attn=self_attn_params(),
                            conv1_w=nxt((D, dff)).astype(MD),
                            conv2_w=nxt((dff, D)).astype(MD))
                       for _ in range(cfg["e_layers"])],
        "enc_norm": dict(gamma=jnp.ones((D,), jnp.float32),
                         beta=jnp.zeros((D,), jnp.float32)),
        "dec_layers": [dict(self_attn=self_attn_params(),
                            cross_attn=cross_attn_params(),
                            conv1_w=nxt((D, dff)).astype(MD),
                            conv2_w=nxt((dff, D)).astype(MD),
                            trend_w=nxt((3 * D, cfg["c_out"])).astype(MD))
                       for _ in range(cfg["d_layers"])],
        "dec_norm": dict(gamma=jnp.ones((D,), jnp.float32),
                         beta=jnp.zeros((D,), jnp.float32)),
        "dec_proj": dict(w=nxt((D, cfg["c_out"])).astype(MD),
                         b=nxt((cfg["c_out"],), 0.01)),
    }
    return params


# ----------------------------------------------------------------------------

if __name__ == "__main__":
    CFG = dict(task_name="long_term_forecast",
               seq_len=16, label_len=8, pred_len=8,
               enc_in=4, dec_in=4, c_out=4,
               d_model=32, n_heads=4, d_ff=32,
               e_layers=2, d_layers=1,
               moving_avg=25, factor=1, dropout=0.1,
               embed="timeF", freq="h", mark_dim=4,
               activation="relu", output_attention=False)

    key = jax.random.PRNGKey(0)
    kp, k1, k2, k3, k4 = jax.random.split(key, 5)
    params = init_params(kp, CFG)

    B = 2
    L_dec = CFG["label_len"] + CFG["pred_len"]
    x_enc = jax.random.normal(k1, (B, CFG["seq_len"], CFG["enc_in"]), jnp.float32)
    x_mark_enc = jax.random.normal(k2, (B, CFG["seq_len"], CFG["mark_dim"]), jnp.float32)
    x_dec = jax.random.normal(k3, (B, L_dec, CFG["dec_in"]), jnp.float32)
    x_mark_dec = jax.random.normal(k4, (B, L_dec, CFG["mark_dim"]), jnp.float32)

    # Moving-average matrices hoisted out of the traced forward (precomputed once).
    A_enc = build_moving_avg_matrix(CFG["seq_len"], CFG["moving_avg"])
    A_dec = build_moving_avg_matrix(L_dec, CFG["moving_avg"])

    fwd = jax.jit(functools.partial(autoformer_forward, cfg=CFG))
    out = fwd(params, x_enc, x_mark_enc, x_dec, x_mark_dec, A_enc, A_dec)
    jax.block_until_ready(out)
    assert out.shape == (B, CFG["pred_len"], CFG["c_out"]), out.shape
    assert bool(jnp.all(jnp.isfinite(out)))
    print("KERNEL_OK")
</pallas_src>

<mosaic_0001>
module attributes {stable_mosaic.version = 11 : i64} {
  func.func @_linear_kernel(%arg0: i32, %arg1: memref<16x16xbf16, #tpu.memory_space<vmem>>, %arg2: memref<16x32xbf16, #tpu.memory_space<vmem>>, %arg3: memref<1x32xf32, #tpu.memory_space<vmem>>, %arg4: memref<16x32xf32, #tpu.memory_space<vmem>>) attributes {dimension_semantics = [#tpu.dimension_semantics<parallel>], iteration_bounds = array<i64: 2>, scalar_prefetch = 0 : i64, scratch_operands = 0 : i64, tpu.core_type = #tpu.core_type<tc>, window_params = [{transform_indices = @transform_0, window_bounds = array<i64: 16, 16>}, {pipeline_mode = #tpu.pipeline_mode<synchronous>, transform_indices = @transform_1, window_bounds = array<i64: 16, 32>}, {pipeline_mode = #tpu.pipeline_mode<synchronous>, transform_indices = @transform_2, window_bounds = array<i64: 1, 32>}, {transform_indices = @transform_3, window_bounds = array<i64: 16, 32>}]} {
    %c0 = arith.constant 0 : index
    %c0_0 = arith.constant 0 : index
    %0 = vector.load %arg1[%c0, %c0_0] : memref<16x16xbf16, #tpu.memory_space<vmem>>, vector<16x16xbf16>
    %c0_1 = arith.constant 0 : index
    %c0_2 = arith.constant 0 : index
    %1 = vector.load %arg2[%c0_1, %c0_2] : memref<16x32xbf16, #tpu.memory_space<vmem>>, vector<16x32xbf16>
    %cst = arith.constant dense<0.000000e+00> : vector<16x32xf32>
    %2 = tpu.matmul %0, %1, %cst {dimension_numbers = #tpu.dot_dimension_numbers<[1], [0], [0], [1], [0, 0, 1, 1], [], []>} : vector<16x16xbf16>, vector<16x32xbf16>, vector<16x32xf32> -> vector<16x32xf32>
    %c0_3 = arith.constant 0 : index
    %c0_4 = arith.constant 0 : index
    %3 = vector.load %arg3[%c0_3, %c0_4] : memref<1x32xf32, #tpu.memory_space<vmem>>, vector<1x32xf32>
    %4 = vector.broadcast %3 : vector<1x32xf32> to vector<16x32xf32>
    %5 = arith.addf %2, %4 : vector<16x32xf32>
    %c0_5 = arith.constant 0 : index
    %c0_6 = arith.constant 0 : index
    %6 = vector.load %arg4[%c0_5, %c0_6] : memref<16x32xf32, #tpu.memory_space<vmem>>, vector<16x32xf32>
    tpu.vector_store %arg4[%c0_5, %c0_6], %5 {strides = array<i32>} : memref<16x32xf32, #tpu.memory_space<vmem>>, vector<16x32xf32>,
    return
  }
  func.func @transform_0(%arg0: i32) -> (i32, i32) {
    %c0_i32 = arith.constant 0 : i32
    %c0_i32_0 = arith.constant 0 : i32
    return %arg0, %c0_i32 : i32, i32
  }
  func.func @transform_1(%arg0: i32) -> (i32, i32) {
    %c0_i32 = arith.constant 0 : i32
    %c0_i32_0 = arith.constant 0 : i32
    %c0_i32_1 = arith.constant 0 : i32
    return %c0_i32, %c0_i32_0 : i32, i32
  }
  func.func @transform_2(%arg0: i32) -> (i32, i32) {
    %c0_i32 = arith.constant 0 : i32
    %c0_i32_0 = arith.constant 0 : i32
    %c0_i32_1 = arith.constant 0 : i32
    return %c0_i32, %c0_i32_0 : i32, i32
  }
  func.func @transform_3(%arg0: i32) -> (i32, i32) {
    %c0_i32 = arith.constant 0 : i32
    %c0_i32_0 = arith.constant 0 : i32
    return %arg0, %c0_i32 : i32, i32
  }
}

module attributes {stable_mosaic.version = 11 : i64} {
  func.func @_linear_kernel(%arg0: i32, %arg1: memref<16x32xbf16, #tpu.memory_space<vmem>>, %arg2: memref<32x96xbf16, #tpu.memory_space<vmem>>, %arg3: memref<1x96xf32, #tpu.memory_space<vmem>>, %arg4: memref<16x96xf32, #tpu.memory_space<vmem>>) attributes {dimension_semantics = [#tpu.dimension_semantics<parallel>], iteration_bounds = array<i64: 2>, scalar_prefetch = 0 : i64, scratch_operands = 0 : i64, tpu.core_type = #tpu.core_type<tc>, window_params = [{transform_indices = @transform_0, window_bounds = array<i64: 16, 32>}, {pipeline_mode = #tpu.pipeline_mode<synchronous>, transform_indices = @transform_1, window_bounds = array<i64: 32, 96>}, {pipeline_mode = #tpu.pipeline_mode<synchronous>, transform_indices = @transform_2, window_bounds = array<i64: 1, 96>}, {transform_indices = @transform_3, window_bounds = array<i64: 16, 96>}]} {
    %c0 = arith.constant 0 : index
    %c0_0 = arith.constant 0 : index
    %0 = vector.load %arg1[%c0, %c0_0] : memref<16x32xbf16, #tpu.memory_space<vmem>>, vector<16x32xbf16>
    %c0_1 = arith.constant 0 : index
    %c0_2 = arith.constant 0 : index
    %1 = vector.load %arg2[%c0_1, %c0_2] : memref<32x96xbf16, #tpu.memory_space<vmem>>, vector<32x96xbf16>
    %cst = arith.constant dense<0.000000e+00> : vector<16x96xf32>
    %2 = tpu.matmul %0, %1, %cst {dimension_numbers = #tpu.dot_dimension_numbers<[1], [0], [0], [1], [0, 0, 1, 1], [], []>} : vector<16x32xbf16>, vector<32x96xbf16>, vector<16x96xf32> -> vector<16x96xf32>
    %c0_3 = arith.constant 0 : index
    %c0_4 = arith.constant 0 : index
    %3 = vector.load %arg3[%c0_3, %c0_4] : memref<1x96xf32, #tpu.memory_space<vmem>>, vector<1x96xf32>
    %4 = vector.broadcast %3 : vector<1x96xf32> to vector<16x96xf32>
    %5 = arith.addf %2, %4 : vector<16x96xf32>
    %c0_5 = arith.constant 0 : index
    %c0_6 = arith.constant 0 : index
    %6 = vector.load %arg4[%c0_5, %c0_6] : memref<16x96xf32, #tpu.memory_space<vmem>>, vector<16x96xf32>
    tpu.vector_store %arg4[%c0_5, %c0_6], %5 {strides = array<i32>} : memref<16x96xf32, #tpu.memory_space<vmem>>, vector<16x96xf32>,
    return
  }
  func.func @transform_0(%arg0: i32) -> (i32, i32) {
    %c0_i32 = arith.constant 0 : i32
    %c0_i32_0 = arith.constant 0 : i32
    return %arg0, %c0_i32 : i32, i32
  }
  func.func @transform_1(%arg0: i32) -> (i32, i32) {
    %c0_i32 = arith.constant 0 : i32
    %c0_i32_0 = arith.constant 0 : i32
    %c0_i32_1 = arith.constant 0 : i32
    return %c0_i32, %c0_i32_0 : i32, i32
  }
  func.func @transform_2(%arg0: i32) -> (i32, i32) {
    %c0_i32 = arith.constant 0 : i32
    %c0_i32_0 = arith.constant 0 : i32
    %c0_i32_1 = arith.constant 0 : i32
    return %c0_i32, %c0_i32_0 : i32, i32
  }
  func.func @transform_3(%arg0: i32) -> (i32, i32) {
    %c0_i32 = arith.constant 0 : i32
    %c0_i32_0 = arith.constant 0 : i32
    return %arg0, %c0_i32 : i32, i32
  }
}

module attributes {stable_mosaic.version = 11 : i64} {
  func.func @_attn_out_decomp_kernel(%arg0: i32, %arg1: memref<1x16x32xbf16, #tpu.memory_space<vmem>>, %arg2: memref<32x32xbf16, #tpu.memory_space<vmem>>, %arg3: memref<1x32xf32, #tpu.memory_space<vmem>>, %arg4: memref<1x16x32xf32, #tpu.memory_space<vmem>>, %arg5: memref<16x16xbf16, #tpu.memory_space<vmem>>, %arg6: memref<1x16x32xf32, #tpu.memory_space<vmem>>) attributes {dimension_semantics = [#tpu.dimension_semantics<parallel>], iteration_bounds = array<i64: 2>, scalar_prefetch = 0 : i64, scratch_operands = 0 : i64, tpu.core_type = #tpu.core_type<tc>, window_params = [{transform_indices = @transform_0, window_bounds = array<i64: 1, 16, 32>}, {pipeline_mode = #tpu.pipeline_mode<synchronous>, transform_indices = @transform_1, window_bounds = array<i64: 32, 32>}, {pipeline_mode = #tpu.pipeline_mode<synchronous>, transform_indices = @transform_2, window_bounds = array<i64: 1, 32>}, {transform_indices = @transform_3, window_bounds = array<i64: 1, 16, 32>}, {pipeline_mode = #tpu.pipeline_mode<synchronous>, transform_indices = @transform_4, window_bounds = array<i64: 16, 16>}, {transform_indices = @transform_5, window_bounds = array<i64: 1, 16, 32>}]} {
    %c0 = arith.constant 0 : index
    %c0_0 = arith.constant 0 : index
    %c0_1 = arith.constant 0 : index
    %0 = vector.load %arg1[%c0, %c0_0, %c0_1] : memref<1x16x32xbf16, #tpu.memory_space<vmem>>, vector<1x16x32xbf16>
    %1 = vector.shape_cast %0 : vector<1x16x32xbf16> to vector<16x32xbf16>
    %c0_2 = arith.constant 0 : index
    %c0_3 = arith.constant 0 : index
    %2 = vector.load %arg2[%c0_2, %c0_3] : memref<32x32xbf16, #tpu.memory_space<vmem>>, vector<32x32xbf16>
    %cst = arith.constant dense<0.000000e+00> : vector<16x32xf32>
    %3 = tpu.matmul %1, %2, %cst {dimension_numbers = #tpu.dot_dimension_numbers<[1], [0], [0], [1], [0, 0, 1, 1], [], []>} : vector<16x32xbf16>, vector<32x32xbf16>, vector<16x32xf32> -> vector<16x32xf32>
    %c0_4 = arith.constant 0 : index
    %c0_5 = arith.constant 0 : index
    %4 = vector.load %arg3[%c0_4, %c0_5] : memref<1x32xf32, #tpu.memory_space<vmem>>, vector<1x32xf32>
    %5 = vector.broadcast %4 : vector<1x32xf32> to vector<16x32xf32>
    %6 = arith.addf %3, %5 : vector<16x32xf32>
    %c0_6 = arith.constant 0 : index
    %c0_7 = arith.constant 0 : index
    %c0_8 = arith.constant 0 : index
    %7 = vector.load %arg4[%c0_6, %c0_7, %c0_8] : memref<1x16x32xf32, #tpu.memory_space<vmem>>, vector<1x16x32xf32>
    %8 = vector.shape_cast %7 : vector<1x16x32xf32> to vector<16x32xf32>
    %9 = arith.addf %6, %8 : vector<16x32xf32>
    %c0_9 = arith.constant 0 : index
    %c0_10 = arith.constant 0 : index
    %10 = vector.load %arg5[%c0_9, %c0_10] : memref<16x16xbf16, #tpu.memory_space<vmem>>, vector<16x16xbf16>
    %11 = arith.truncf %9 : vector<16x32xf32> to vector<16x32xbf16>
    %cst_11 = arith.constant dense<0.000000e+00> : vector<16x32xf32>
    %12 = tpu.matmul %10, %11, %cst_11 {dimension_numbers = #tpu.dot_dimension_numbers<[1], [0], [0], [1], [0, 0, 1, 1], [], []>} : vector<16x16xbf16>, vector<16x32xbf16>, vector<16x32xf32> -> vector<16x32xf32>
    %13 = arith.subf %9, %12 : vector<16x32xf32>
    %c0_12 = arith.constant 0 : index
    %c0_13 = arith.constant 0 : index
    %c0_14 = arith.constant 0 : index
    %14 = vector.load %arg6[%c0_12, %c0_13, %c0_14] : memref<1x16x32xf32, #tpu.memory_space<vmem>>, vector<1x16x32xf32>
    %15 = vector.shape_cast %14 : vector<1x16x32xf32> to vector<16x32xf32>
    %16 = vector.shape_cast %13 : vector<16x32xf32> to vector<1x16x32xf32>
    tpu.vector_store %arg6[%c0_12, %c0_13, %c0_14], %16 {strides = array<i32>} : memref<1x16x32xf32, #tpu.memory_space<vmem>>, vector<1x16x32xf32>,
    return
  }
  func.func @transform_0(%arg0: i32) -> (i32, i32, i32) {
    %c0_i32 = arith.constant 0 : i32
    %c0_i32_0 = arith.constant 0 : i32
    %c0_i32_1 = arith.constant 0 : i32
    return %arg0, %c0_i32, %c0_i32_0 : i32, i32, i32
  }
  func.func @transform_1(%arg0: i32) -> (i32, i32) {
    %c0_i32 = arith.constant 0 : i32
    %c0_i32_0 = arith.constant 0 : i32
    %c0_i32_1 = arith.constant 0 : i32
    return %c0_i32, %c0_i32_0 : i32, i32
  }
  func.func @transform_2(%arg0: i32) -> (i32, i32) {
    %c0_i32 = arith.constant 0 : i32
    %c0_i32_0 = arith.constant 0 : i32
    %c0_i32_1 = arith.constant 0 : i32
    return %c0_i32, %c0_i32_0 : i32, i32
  }
  func.func @transform_3(%arg0: i32) -> (i32, i32, i32) {
    %c0_i32 = arith.constant 0 : i32
    %c0_i32_0 = arith.constant 0 : i32
    %c0_i32_1 = arith.constant 0 : i32
    return %arg0, %c0_i32, %c0_i32_0 : i32, i32, i32
  }
  func.func @transform_4(%arg0: i32) -> (i32, i32) {
    %c0_i32 = arith.constant 0 : i32
    %c0_i32_0 = arith.constant 0 : i32
    %c0_i32_1 = arith.constant 0 : i32
    return %c0_i32, %c0_i32_0 : i32, i32
  }
  func.func @transform_5(%arg0: i32) -> (i32, i32, i32) {
    %c0_i32 = arith.constant 0 : i32
    %c0_i32_0 = arith.constant 0 : i32
    %c0_i32_1 = arith.constant 0 : i32
    return %arg0, %c0_i32, %c0_i32_0 : i32, i32, i32
  }
}

module attributes {stable_mosaic.version = 11 : i64} {
  func.func @_linear_kernel(%arg0: i32, %arg1: memref<16x32xbf16, #tpu.memory_space<vmem>>, %arg2: memref<32x64xbf16, #tpu.memory_space<vmem>>, %arg3: memref<1x64xf32, #tpu.memory_space<vmem>>, %arg4: memref<16x64xf32, #tpu.memory_space<vmem>>) attributes {dimension_semantics = [#tpu.dimension_semantics<parallel>], iteration_bounds = array<i64: 2>, scalar_prefetch = 0 : i64, scratch_operands = 0 : i64, tpu.core_type = #tpu.core_type<tc>, window_params = [{transform_indices = @transform_0, window_bounds = array<i64: 16, 32>}, {pipeline_mode = #tpu.pipeline_mode<synchronous>, transform_indices = @transform_1, window_bounds = array<i64: 32, 64>}, {pipeline_mode = #tpu.pipeline_mode<synchronous>, transform_indices = @transform_2, window_bounds = array<i64: 1, 64>}, {transform_indices = @transform_3, window_bounds = array<i64: 16, 64>}]} {
    %c0 = arith.constant 0 : index
    %c0_0 = arith.constant 0 : index
    %0 = vector.load %arg1[%c0, %c0_0] : memref<16x32xbf16, #tpu.memory_space<vmem>>, vector<16x32xbf16>
    %c0_1 = arith.constant 0 : index
    %c0_2 = arith.constant 0 : index
    %1 = vector.load %arg2[%c0_1, %c0_2] : memref<32x64xbf16, #tpu.memory_space<vmem>>, vector<32x64xbf16>
    %cst = arith.constant dense<0.000000e+00> : vector<16x64xf32>
    %2 = tpu.matmul %0, %1, %cst {dimension_numbers = #tpu.dot_dimension_numbers<[1], [0], [0], [1], [0, 0, 1, 1], [], []>} : vector<16x32xbf16>, vector<32x64xbf16>, vector<16x64xf32> -> vector<16x64xf32>
    %c0_3 = arith.constant 0 : index
    %c0_4 = arith.constant 0 : index
    %3 = vector.load %arg3[%c0_3, %c0_4] : memref<1x64xf32, #tpu.memory_space<vmem>>, vector<1x64xf32>
    %4 = vector.broadcast %3 : vector<1x64xf32> to vector<16x64xf32>
    %5 = arith.addf %2, %4 : vector<16x64xf32>
    %c0_5 = arith.constant 0 : index
    %c0_6 = arith.constant 0 : index
    %6 = vector.load %arg4[%c0_5, %c0_6] : memref<16x64xf32, #tpu.memory_space<vmem>>, vector<16x64xf32>
    tpu.vector_store %arg4[%c0_5, %c0_6], %5 {strides = array<i32>} : memref<16x64xf32, #tpu.memory_space<vmem>>, vector<16x64xf32>,
    return
  }
  func.func @transform_0(%arg0: i32) -> (i32, i32) {
    %c0_i32 = arith.constant 0 : i32
    %c0_i32_0 = arith.constant 0 : i32
    return %arg0, %c0_i32 : i32, i32
  }
  func.func @transform_1(%arg0: i32) -> (i32, i32) {
    %c0_i32 = arith.constant 0 : i32
    %c0_i32_0 = arith.constant 0 : i32
    %c0_i32_1 = arith.constant 0 : i32
    return %c0_i32, %c0_i32_0 : i32, i32
  }
  func.func @transform_2(%arg0: i32) -> (i32, i32) {
    %c0_i32 = arith.constant 0 : i32
    %c0_i32_0 = arith.constant 0 : i32
    %c0_i32_1 = arith.constant 0 : i32
    return %c0_i32, %c0_i32_0 : i32, i32
  }
  func.func @transform_3(%arg0: i32) -> (i32, i32) {
    %c0_i32 = arith.constant 0 : i32
    %c0_i32_0 = arith.constant 0 : i32
    return %arg0, %c0_i32 : i32, i32
  }
}

module attributes {stable_mosaic.version = 11 : i64} {
  func.func @_ffn_decomp_kernel(%arg0: i32, %arg1: memref<1x16x32xf32, #tpu.memory_space<vmem>>, %arg2: memref<32x32xbf16, #tpu.memory_space<vmem>>, %arg3: memref<32x32xbf16, #tpu.memory_space<vmem>>, %arg4: memref<16x16xbf16, #tpu.memory_space<vmem>>, %arg5: memref<1x16x32xf32, #tpu.memory_space<vmem>>) attributes {dimension_semantics = [#tpu.dimension_semantics<parallel>], iteration_bounds = array<i64: 2>, scalar_prefetch = 0 : i64, scratch_operands = 0 : i64, tpu.core_type = #tpu.core_type<tc>, window_params = [{transform_indices = @transform_0, window_bounds = array<i64: 1, 16, 32>}, {pipeline_mode = #tpu.pipeline_mode<synchronous>, transform_indices = @transform_1, window_bounds = array<i64: 32, 32>}, {pipeline_mode = #tpu.pipeline_mode<synchronous>, transform_indices = @transform_2, window_bounds = array<i64: 32, 32>}, {pipeline_mode = #tpu.pipeline_mode<synchronous>, transform_indices = @transform_3, window_bounds = array<i64: 16, 16>}, {transform_indices = @transform_4, window_bounds = array<i64: 1, 16, 32>}]} {
    %c0 = arith.constant 0 : index
    %c0_0 = arith.constant 0 : index
    %c0_1 = arith.constant 0 : index
    %0 = vector.load %arg1[%c0, %c0_0, %c0_1] : memref<1x16x32xf32, #tpu.memory_space<vmem>>, vector<1x16x32xf32>
    %1 = vector.shape_cast %0 : vector<1x16x32xf32> to vector<16x32xf32>
    %2 = arith.truncf %1 : vector<16x32xf32> to vector<16x32xbf16>
    %c0_2 = arith.constant 0 : index
    %c0_3 = arith.constant 0 : index
    %3 = vector.load %arg2[%c0_2, %c0_3] : memref<32x32xbf16, #tpu.memory_space<vmem>>, vector<32x32xbf16>
    %cst = arith.constant dense<0.000000e+00> : vector<16x32xf32>
    %4 = tpu.matmul %2, %3, %cst {dimension_numbers = #tpu.dot_dimension_numbers<[1], [0], [0], [1], [0, 0, 1, 1], [], []>} : vector<16x32xbf16>, vector<32x32xbf16>, vector<16x32xf32> -> vector<16x32xf32>
    %cst_4 = arith.constant 0.000000e+00 : f32
    %5 = vector.broadcast %cst_4 : f32 to vector<16x32xf32>
    %6 = arith.maximumf %4, %5 : vector<16x32xf32>
    %7 = arith.truncf %6 : vector<16x32xf32> to vector<16x32xbf16>
    %c0_5 = arith.constant 0 : index
    %c0_6 = arith.constant 0 : index
    %8 = vector.load %arg3[%c0_5, %c0_6] : memref<32x32xbf16, #tpu.memory_space<vmem>>, vector<32x32xbf16>
    %cst_7 = arith.constant dense<0.000000e+00> : vector<16x32xf32>
    %9 = tpu.matmul %7, %8, %cst_7 {dimension_numbers = #tpu.dot_dimension_numbers<[1], [0], [0], [1], [0, 0, 1, 1], [], []>} : vector<16x32xbf16>, vector<32x32xbf16>, vector<16x32xf32> -> vector<16x32xf32>
    %10 = arith.addf %1, %9 : vector<16x32xf32>
    %c0_8 = arith.constant 0 : index
    %c0_9 = arith.constant 0 : index
    %11 = vector.load %arg4[%c0_8, %c0_9] : memref<16x16xbf16, #tpu.memory_space<vmem>>, vector<16x16xbf16>
    %12 = arith.truncf %10 : vector<16x32xf32> to vector<16x32xbf16>
    %cst_10 = arith.constant dense<0.000000e+00> : vector<16x32xf32>
    %13 = tpu.matmul %11, %12, %cst_10 {dimension_numbers = #tpu.dot_dimension_numbers<[1], [0], [0], [1], [0, 0, 1, 1], [], []>} : vector<16x16xbf16>, vector<16x32xbf16>, vector<16x32xf32> -> vector<16x32xf32>
    %14 = arith.subf %10, %13 : vector<16x32xf32>
    %c0_11 = arith.constant 0 : index
    %c0_12 = arith.constant 0 : index
    %c0_13 = arith.constant 0 : index
    %15 = vector.load %arg5[%c0_11, %c0_12, %c0_13] : memref<1x16x32xf32, #tpu.memory_space<vmem>>, vector<1x16x32xf32>
    %16 = vector.shape_cast %15 : vector<1x16x32xf32> to vector<16x32xf32>
    %17 = vector.shape_cast %14 : vector<16x32xf32> to vector<1x16x32xf32>
    tpu.vector_store %arg5[%c0_11, %c0_12, %c0_13], %17 {strides = array<i32>} : memref<1x16x32xf32, #tpu.memory_space<vmem>>, vector<1x16x32xf32>,
    return
  }
  func.func @transform_0(%arg0: i32) -> (i32, i32, i32) {
    %c0_i32 = arith.constant 0 : i32
    %c0_i32_0 = arith.constant 0 : i32
    %c0_i32_1 = arith.constant 0 : i32
    return %arg0, %c0_i32, %c0_i32_0 : i32, i32, i32
  }
  func.func @transform_1(%arg0: i32) -> (i32, i32) {
    %c0_i32 = arith.constant 0 : i32
    %c0_i32_0 = arith.constant 0 : i32
    %c0_i32_1 = arith.constant 0 : i32
    return %c0_i32, %c0_i32_0 : i32, i32
  }
  func.func @transform_2(%arg0: i32) -> (i32, i32) {
    %c0_i32 = arith.constant 0 : i32
    %c0_i32_0 = arith.constant 0 : i32
    %c0_i32_1 = arith.constant 0 : i32
    return %c0_i32, %c0_i32_0 : i32, i32
  }
  func.func @transform_3(%arg0: i32) -> (i32, i32) {
    %c0_i32 = arith.constant 0 : i32
    %c0_i32_0 = arith.constant 0 : i32
    %c0_i32_1 = arith.constant 0 : i32
    return %c0_i32, %c0_i32_0 : i32, i32
  }
  func.func @transform_4(%arg0: i32) -> (i32, i32, i32) {
    %c0_i32 = arith.constant 0 : i32
    %c0_i32_0 = arith.constant 0 : i32
    %c0_i32_1 = arith.constant 0 : i32
    return %arg0, %c0_i32, %c0_i32_0 : i32, i32, i32
  }
}

module attributes {stable_mosaic.version = 11 : i64} {
  func.func @_my_layernorm_kernel(%arg0: i32, %arg1: memref<1x16x32xf32, #tpu.memory_space<vmem>>, %arg2: memref<1x1x32xf32, #tpu.memory_space<vmem>>, %arg3: memref<1x1x32xf32, #tpu.memory_space<vmem>>, %arg4: memref<1x16x32xf32, #tpu.memory_space<vmem>>) attributes {dimension_semantics = [#tpu.dimension_semantics<parallel>], iteration_bounds = array<i64: 2>, scalar_prefetch = 0 : i64, scratch_operands = 0 : i64, tpu.core_type = #tpu.core_type<tc>, window_params = [{transform_indices = @transform_0, window_bounds = array<i64: 1, 16, 32>}, {pipeline_mode = #tpu.pipeline_mode<synchronous>, transform_indices = @transform_1, window_bounds = array<i64: 1, 1, 32>}, {pipeline_mode = #tpu.pipeline_mode<synchronous>, transform_indices = @transform_2, window_bounds = array<i64: 1, 1, 32>}, {transform_indices = @transform_3, window_bounds = array<i64: 1, 16, 32>}]} {
    %c0 = arith.constant 0 : index
    %c0_0 = arith.constant 0 : index
    %c0_1 = arith.constant 0 : index
    %0 = vector.load %arg1[%c0, %c0_0, %c0_1] : memref<1x16x32xf32, #tpu.memory_space<vmem>>, vector<1x16x32xf32>
    %cst = arith.constant dense<0.000000e+00> : vector<1x16xf32>
    %1 = vector.multi_reduction <add>, %0, %cst [2] : vector<1x16x32xf32> to vector<1x16xf32>
    %2 = vector.shape_cast %1 : vector<1x16xf32> to vector<1x16x1xf32>
    %cst_2 = arith.constant 3.200000e+01 : f32
    %3 = vector.broadcast %cst_2 : f32 to vector<1x16x1xf32>
    %4 = arith.divf %2, %3 : vector<1x16x1xf32>
    %5 = vector.broadcast %4 : vector<1x16x1xf32> to vector<1x16x32xf32>
    %6 = arith.subf %0, %5 : vector<1x16x32xf32>
    %7 = arith.mulf %6, %6 : vector<1x16x32xf32>
    %cst_3 = arith.constant dense<0.000000e+00> : vector<1x16xf32>
    %8 = vector.multi_reduction <add>, %7, %cst_3 [2] : vector<1x16x32xf32> to vector<1x16xf32>
    %9 = vector.shape_cast %8 : vector<1x16xf32> to vector<1x16x1xf32>
    %cst_4 = arith.constant 3.200000e+01 : f32
    %10 = vector.broadcast %cst_4 : f32 to vector<1x16x1xf32>
    %11 = arith.divf %9, %10 : vector<1x16x1xf32>
    %12 = vector.broadcast %4 : vector<1x16x1xf32> to vector<1x16x32xf32>
    %13 = arith.subf %0, %12 : vector<1x16x32xf32>
    %cst_5 = arith.constant 9.99999974E-6 : f32
    %14 = vector.broadcast %cst_5 : f32 to vector<1x16x1xf32>
    %15 = arith.addf %11, %14 : vector<1x16x1xf32>
    %16 = math.rsqrt %15 : vector<1x16x1xf32>
    %17 = vector.broadcast %16 : vector<1x16x1xf32> to vector<1x16x32xf32>
    %18 = arith.mulf %13, %17 : vector<1x16x32xf32>
    %c0_6 = arith.constant 0 : index
    %c0_7 = arith.constant 0 : index
    %c0_8 = arith.constant 0 : index
    %19 = vector.load %arg2[%c0_6, %c0_7, %c0_8] : memref<1x1x32xf32, #tpu.memory_space<vmem>>, vector<1x1x32xf32>
    %20 = vector.broadcast %19 : vector<1x1x32xf32> to vector<1x16x32xf32>
    %21 = arith.mulf %18, %20 : vector<1x16x32xf32>
    %c0_9 = arith.constant 0 : index
    %c0_10 = arith.constant 0 : index
    %c0_11 = arith.constant 0 : index
    %22 = vector.load %arg3[%c0_9, %c0_10, %c0_11] : memref<1x1x32xf32, #tpu.memory_space<vmem>>, vector<1x1x32xf32>
    %23 = vector.broadcast %22 : vector<1x1x32xf32> to vector<1x16x32xf32>
    %24 = arith.addf %21, %23 : vector<1x16x32xf32>
    %cst_12 = arith.constant dense<0.000000e+00> : vector<1x32xf32>
    %25 = vector.multi_reduction <add>, %24, %cst_12 [1] : vector<1x16x32xf32> to vector<1x32xf32>
    %26 = vector.shape_cast %25 : vector<1x32xf32> to vector<1x1x32xf32>
    %cst_13 = arith.constant 1.600000e+01 : f32
    %27 = vector.broadcast %cst_13 : f32 to vector<1x1x32xf32>
    %28 = arith.divf %26, %27 : vector<1x1x32xf32>
    %29 = vector.broadcast %28 : vector<1x1x32xf32> to vector<1x16x32xf32>
    %30 = arith.subf %24, %29 : vector<1x16x32xf32>
    %c0_14 = arith.constant 0 : index
    %c0_15 = arith.constant 0 : index
    %c0_16 = arith.constant 0 : index
    %31 = vector.load %arg4[%c0_14, %c0_15, %c0_16] : memref<1x16x32xf32, #tpu.memory_space<vmem>>, vector<1x16x32xf32>
    tpu.vector_store %arg4[%c0_14, %c0_15, %c0_16], %30 {strides = array<i32>} : memref<1x16x32xf32, #tpu.memory_space<vmem>>, vector<1x16x32xf32>,
    return
  }
  func.func @transform_0(%arg0: i32) -> (i32, i32, i32) {
    %c0_i32 = arith.constant 0 : i32
    %c0_i32_0 = arith.constant 0 : i32
    %c0_i32_1 = arith.constant 0 : i32
    return %arg0, %c0_i32, %c0_i32_0 : i32, i32, i32
  }
  func.func @transform_1(%arg0: i32) -> (i32, i32, i32) {
    %c0_i32 = arith.constant 0 : i32
    %c0_i32_0 = arith.constant 0 : i32
    %c0_i32_1 = arith.constant 0 : i32
    %c0_i32_2 = arith.constant 0 : i32
    return %c0_i32, %c0_i32_0, %c0_i32_1 : i32, i32, i32
  }
  func.func @transform_2(%arg0: i32) -> (i32, i32, i32) {
    %c0_i32 = arith.constant 0 : i32
    %c0_i32_0 = arith.constant 0 : i32
    %c0_i32_1 = arith.constant 0 : i32
    %c0_i32_2 = arith.constant 0 : i32
    return %c0_i32, %c0_i32_0, %c0_i32_1 : i32, i32, i32
  }
  func.func @transform_3(%arg0: i32) -> (i32, i32, i32) {
    %c0_i32 = arith.constant 0 : i32
    %c0_i32_0 = arith.constant 0 : i32
    %c0_i32_1 = arith.constant 0 : i32
    return %arg0, %c0_i32, %c0_i32_0 : i32, i32, i32
  }
}

module attributes {stable_mosaic.version = 11 : i64} {
  func.func @_linear_kernel(%arg0: i32, %arg1: memref<16x32xbf16, #tpu.memory_space<vmem>>, %arg2: memref<32x32xbf16, #tpu.memory_space<vmem>>, %arg3: memref<1x32xf32, #tpu.memory_space<vmem>>, %arg4: memref<16x32xf32, #tpu.memory_space<vmem>>) attributes {dimension_semantics = [#tpu.dimension_semantics<parallel>], iteration_bounds = array<i64: 2>, scalar_prefetch = 0 : i64, scratch_operands = 0 : i64, tpu.core_type = #tpu.core_type<tc>, window_params = [{transform_indices = @transform_0, window_bounds = array<i64: 16, 32>}, {pipeline_mode = #tpu.pipeline_mode<synchronous>, transform_indices = @transform_1, window_bounds = array<i64: 32, 32>}, {pipeline_mode = #tpu.pipeline_mode<synchronous>, transform_indices = @transform_2, window_bounds = array<i64: 1, 32>}, {transform_indices = @transform_3, window_bounds = array<i64: 16, 32>}]} {
    %c0 = arith.constant 0 : index
    %c0_0 = arith.constant 0 : index
    %0 = vector.load %arg1[%c0, %c0_0] : memref<16x32xbf16, #tpu.memory_space<vmem>>, vector<16x32xbf16>
    %c0_1 = arith.constant 0 : index
    %c0_2 = arith.constant 0 : index
    %1 = vector.load %arg2[%c0_1, %c0_2] : memref<32x32xbf16, #tpu.memory_space<vmem>>, vector<32x32xbf16>
    %cst = arith.constant dense<0.000000e+00> : vector<16x32xf32>
    %2 = tpu.matmul %0, %1, %cst {dimension_numbers = #tpu.dot_dimension_numbers<[1], [0], [0], [1], [0, 0, 1, 1], [], []>} : vector<16x32xbf16>, vector<32x32xbf16>, vector<16x32xf32> -> vector<16x32xf32>
    %c0_3 = arith.constant 0 : index
    %c0_4 = arith.constant 0 : index
    %3 = vector.load %arg3[%c0_3, %c0_4] : memref<1x32xf32, #tpu.memory_space<vmem>>, vector<1x32xf32>
    %4 = vector.broadcast %3 : vector<1x32xf32> to vector<16x32xf32>
    %5 = arith.addf %2, %4 : vector<16x32xf32>
    %c0_5 = arith.constant 0 : index
    %c0_6 = arith.constant 0 : index
    %6 = vector.load %arg4[%c0_5, %c0_6] : memref<16x32xf32, #tpu.memory_space<vmem>>, vector<16x32xf32>
    tpu.vector_store %arg4[%c0_5, %c0_6], %5 {strides = array<i32>} : memref<16x32xf32, #tpu.memory_space<vmem>>, vector<16x32xf32>,
    return
  }
  func.func @transform_0(%arg0: i32) -> (i32, i32) {
    %c0_i32 = arith.constant 0 : i32
    %c0_i32_0 = arith.constant 0 : i32
    return %arg0, %c0_i32 : i32, i32
  }
  func.func @transform_1(%arg0: i32) -> (i32, i32) {
    %c0_i32 = arith.constant 0 : i32
    %c0_i32_0 = arith.constant 0 : i32
    %c0_i32_1 = arith.constant 0 : i32
    return %c0_i32, %c0_i32_0 : i32, i32
  }
  func.func @transform_2(%arg0: i32) -> (i32, i32) {
    %c0_i32 = arith.constant 0 : i32
    %c0_i32_0 = arith.constant 0 : i32
    %c0_i32_1 = arith.constant 0 : i32
    return %c0_i32, %c0_i32_0 : i32, i32
  }
  func.func @transform_3(%arg0: i32) -> (i32, i32) {
    %c0_i32 = arith.constant 0 : i32
    %c0_i32_0 = arith.constant 0 : i32
    return %arg0, %c0_i32 : i32, i32
  }
}

module attributes {stable_mosaic.version = 11 : i64} {
  func.func @_attn_out_decomp_kernel(%arg0: i32, %arg1: memref<1x16x32xbf16, #tpu.memory_space<vmem>>, %arg2: memref<32x32xbf16, #tpu.memory_space<vmem>>, %arg3: memref<1x32xf32, #tpu.memory_space<vmem>>, %arg4: memref<1x16x32xf32, #tpu.memory_space<vmem>>, %arg5: memref<16x16xbf16, #tpu.memory_space<vmem>>, %arg6: memref<1x16x32xf32, #tpu.memory_space<vmem>>, %arg7: memref<1x16x32xf32, #tpu.memory_space<vmem>>) attributes {dimension_semantics = [#tpu.dimension_semantics<parallel>], iteration_bounds = array<i64: 2>, scalar_prefetch = 0 : i64, scratch_operands = 0 : i64, tpu.core_type = #tpu.core_type<tc>, window_params = [{transform_indices = @transform_0, window_bounds = array<i64: 1, 16, 32>}, {pipeline_mode = #tpu.pipeline_mode<synchronous>, transform_indices = @transform_1, window_bounds = array<i64: 32, 32>}, {pipeline_mode = #tpu.pipeline_mode<synchronous>, transform_indices = @transform_2, window_bounds = array<i64: 1, 32>}, {transform_indices = @transform_3, window_bounds = array<i64: 1, 16, 32>}, {pipeline_mode = #tpu.pipeline_mode<synchronous>, transform_indices = @transform_4, window_bounds = array<i64: 16, 16>}, {transform_indices = @transform_5, window_bounds = array<i64: 1, 16, 32>}, {transform_indices = @transform_6, window_bounds = array<i64: 1, 16, 32>}]} {
    %c0 = arith.constant 0 : index
    %c0_0 = arith.constant 0 : index
    %c0_1 = arith.constant 0 : index
    %0 = vector.load %arg1[%c0, %c0_0, %c0_1] : memref<1x16x32xbf16, #tpu.memory_space<vmem>>, vector<1x16x32xbf16>
    %1 = vector.shape_cast %0 : vector<1x16x32xbf16> to vector<16x32xbf16>
    %c0_2 = arith.constant 0 : index
    %c0_3 = arith.constant 0 : index
    %2 = vector.load %arg2[%c0_2, %c0_3] : memref<32x32xbf16, #tpu.memory_space<vmem>>, vector<32x32xbf16>
    %cst = arith.constant dense<0.000000e+00> : vector<16x32xf32>
    %3 = tpu.matmul %1, %2, %cst {dimension_numbers = #tpu.dot_dimension_numbers<[1], [0], [0], [1], [0, 0, 1, 1], [], []>} : vector<16x32xbf16>, vector<32x32xbf16>, vector<16x32xf32> -> vector<16x32xf32>
    %c0_4 = arith.constant 0 : index
    %c0_5 = arith.constant 0 : index
    %4 = vector.load %arg3[%c0_4, %c0_5] : memref<1x32xf32, #tpu.memory_space<vmem>>, vector<1x32xf32>
    %5 = vector.broadcast %4 : vector<1x32xf32> to vector<16x32xf32>
    %6 = arith.addf %3, %5 : vector<16x32xf32>
    %c0_6 = arith.constant 0 : index
    %c0_7 = arith.constant 0 : index
    %c0_8 = arith.constant 0 : index
    %7 = vector.load %arg4[%c0_6, %c0_7, %c0_8] : memref<1x16x32xf32, #tpu.memory_space<vmem>>, vector<1x16x32xf32>
    %8 = vector.shape_cast %7 : vector<1x16x32xf32> to vector<16x32xf32>
    %9 = arith.addf %6, %8 : vector<16x32xf32>
    %c0_9 = arith.constant 0 : index
    %c0_10 = arith.constant 0 : index
    %10 = vector.load %arg5[%c0_9, %c0_10] : memref<16x16xbf16, #tpu.memory_space<vmem>>, vector<16x16xbf16>
    %11 = arith.truncf %9 : vector<16x32xf32> to vector<16x32xbf16>
    %cst_11 = arith.constant dense<0.000000e+00> : vector<16x32xf32>
    %12 = tpu.matmul %10, %11, %cst_11 {dimension_numbers = #tpu.dot_dimension_numbers<[1], [0], [0], [1], [0, 0, 1, 1], [], []>} : vector<16x16xbf16>, vector<16x32xbf16>, vector<16x32xf32> -> vector<16x32xf32>
    %13 = arith.subf %9, %12 : vector<16x32xf32>
    %c0_12 = arith.constant 0 : index
    %c0_13 = arith.constant 0 : index
    %c0_14 = arith.constant 0 : index
    %14 = vector.load %arg6[%c0_12, %c0_13, %c0_14] : memref<1x16x32xf32, #tpu.memory_space<vmem>>, vector<1x16x32xf32>
    %15 = vector.shape_cast %14 : vector<1x16x32xf32> to vector<16x32xf32>
    %16 = vector.shape_cast %13 : vector<16x32xf32> to vector<1x16x32xf32>
    tpu.vector_store %arg6[%c0_12, %c0_13, %c0_14], %16 {strides = array<i32>} : memref<1x16x32xf32, #tpu.memory_space<vmem>>, vector<1x16x32xf32>,
    %c0_15 = arith.constant 0 : index
    %c0_16 = arith.constant 0 : index
    %c0_17 = arith.constant 0 : index
    %17 = vector.load %arg7[%c0_15, %c0_16, %c0_17] : memref<1x16x32xf32, #tpu.memory_space<vmem>>, vector<1x16x32xf32>
    %18 = vector.shape_cast %17 : vector<1x16x32xf32> to vector<16x32xf32>
    %19 = vector.shape_cast %12 : vector<16x32xf32> to vector<1x16x32xf32>
    tpu.vector_store %arg7[%c0_15, %c0_16, %c0_17], %19 {strides = array<i32>} : memref<1x16x32xf32, #tpu.memory_space<vmem>>, vector<1x16x32xf32>,
    return
  }
  func.func @transform_0(%arg0: i32) -> (i32, i32, i32) {
    %c0_i32 = arith.constant 0 : i32
    %c0_i32_0 = arith.constant 0 : i32
    %c0_i32_1 = arith.constant 0 : i32
    return %arg0, %c0_i32, %c0_i32_0 : i32, i32, i32
  }
  func.func @transform_1(%arg0: i32) -> (i32, i32) {
    %c0_i32 = arith.constant 0 : i32
    %c0_i32_0 = arith.constant 0 : i32
    %c0_i32_1 = arith.constant 0 : i32
    return %c0_i32, %c0_i32_0 : i32, i32
  }
  func.func @transform_2(%arg0: i32) -> (i32, i32) {
    %c0_i32 = arith.constant 0 : i32
    %c0_i32_0 = arith.constant 0 : i32
    %c0_i32_1 = arith.constant 0 : i32
    return %c0_i32, %c0_i32_0 : i32, i32
  }
  func.func @transform_3(%arg0: i32) -> (i32, i32, i32) {
    %c0_i32 = arith.constant 0 : i32
    %c0_i32_0 = arith.constant 0 : i32
    %c0_i32_1 = arith.constant 0 : i32
    return %arg0, %c0_i32, %c0_i32_0 : i32, i32, i32
  }
  func.func @transform_4(%arg0: i32) -> (i32, i32) {
    %c0_i32 = arith.constant 0 : i32
    %c0_i32_0 = arith.constant 0 : i32
    %c0_i32_1 = arith.constant 0 : i32
    return %c0_i32, %c0_i32_0 : i32, i32
  }
  func.func @transform_5(%arg0: i32) -> (i32, i32, i32) {
    %c0_i32 = arith.constant 0 : i32
    %c0_i32_0 = arith.constant 0 : i32
    %c0_i32_1 = arith.constant 0 : i32
    return %arg0, %c0_i32, %c0_i32_0 : i32, i32, i32
  }
  func.func @transform_6(%arg0: i32) -> (i32, i32, i32) {
    %c0_i32 = arith.constant 0 : i32
    %c0_i32_0 = arith.constant 0 : i32
    %c0_i32_1 = arith.constant 0 : i32
    return %arg0, %c0_i32, %c0_i32_0 : i32, i32, i32
  }
}

module attributes {stable_mosaic.version = 11 : i64} {
  func.func @_decomp_kernel(%arg0: i32, %arg1: memref<16x16xf32, #tpu.memory_space<vmem>>, %arg2: memref<1x16x4xf32, #tpu.memory_space<vmem>>, %arg3: memref<1x16x4xf32, #tpu.memory_space<vmem>>, %arg4: memref<1x16x4xf32, #tpu.memory_space<vmem>>) attributes {dimension_semantics = [#tpu.dimension_semantics<parallel>], iteration_bounds = array<i64: 2>, scalar_prefetch = 0 : i64, scratch_operands = 0 : i64, tpu.core_type = #tpu.core_type<tc>, window_params = [{pipeline_mode = #tpu.pipeline_mode<synchronous>, transform_indices = @transform_0, window_bounds = array<i64: 16, 16>}, {transform_indices = @transform_1, window_bounds = array<i64: 1, 16, 4>}, {transform_indices = @transform_2, window_bounds = array<i64: 1, 16, 4>}, {transform_indices = @transform_3, window_bounds = array<i64: 1, 16, 4>}]} {
    %c0 = arith.constant 0 : index
    %c0_0 = arith.constant 0 : index
    %c0_1 = arith.constant 0 : index
    %0 = vector.load %arg2[%c0, %c0_0, %c0_1] : memref<1x16x4xf32, #tpu.memory_space<vmem>>, vector<1x16x4xf32>
    %1 = vector.shape_cast %0 : vector<1x16x4xf32> to vector<16x4xf32>
    %c0_2 = arith.constant 0 : index
    %c0_3 = arith.constant 0 : index
    %2 = vector.load %arg1[%c0_2, %c0_3] : memref<16x16xf32, #tpu.memory_space<vmem>>, vector<16x16xf32>
    %cst = arith.constant dense<0.000000e+00> : vector<16x4xf32>
    %3 = tpu.matmul %2, %1, %cst {dimension_numbers = #tpu.dot_dimension_numbers<[1], [0], [0], [1], [0, 0, 1, 1], [], []>} : vector<16x16xf32>, vector<16x4xf32>, vector<16x4xf32> -> vector<16x4xf32>
    %c0_4 = arith.constant 0 : index
    %c0_5 = arith.constant 0 : index
    %c0_6 = arith.constant 0 : index
    %4 = vector.load %arg4[%c0_4, %c0_5, %c0_6] : memref<1x16x4xf32, #tpu.memory_space<vmem>>, vector<1x16x4xf32>
    %5 = vector.shape_cast %4 : vector<1x16x4xf32> to vector<16x4xf32>
    %6 = vector.shape_cast %3 : vector<16x4xf32> to vector<1x16x4xf32>
    tpu.vector_store %arg4[%c0_4, %c0_5, %c0_6], %6 {strides = array<i32>} : memref<1x16x4xf32, #tpu.memory_space<vmem>>, vector<1x16x4xf32>,
    %7 = arith.subf %1, %3 : vector<16x4xf32>
    %c0_7 = arith.constant 0 : index
    %c0_8 = arith.constant 0 : index
    %c0_9 = arith.constant 0 : index
    %8 = vector.load %arg3[%c0_7, %c0_8, %c0_9] : memref<1x16x4xf32, #tpu.memory_space<vmem>>, vector<1x16x4xf32>
    %9 = vector.shape_cast %8 : vector<1x16x4xf32> to vector<16x4xf32>
    %10 = vector.shape_cast %7 : vector<16x4xf32> to vector<1x16x4xf32>
    tpu.vector_store %arg3[%c0_7, %c0_8, %c0_9], %10 {strides = array<i32>} : memref<1x16x4xf32, #tpu.memory_space<vmem>>, vector<1x16x4xf32>,
    return
  }
  func.func @transform_0(%arg0: i32) -> (i32, i32) {
    %c0_i32 = arith.constant 0 : i32
    %c0_i32_0 = arith.constant 0 : i32
    %c0_i32_1 = arith.constant 0 : i32
    return %c0_i32, %c0_i32_0 : i32, i32
  }
  func.func @transform_1(%arg0: i32) -> (i32, i32, i32) {
    %c0_i32 = arith.constant 0 : i32
    %c0_i32_0 = arith.constant 0 : i32
    %c0_i32_1 = arith.constant 0 : i32
    return %arg0, %c0_i32, %c0_i32_0 : i32, i32, i32
  }
  func.func @transform_2(%arg0: i32) -> (i32, i32, i32) {
    %c0_i32 = arith.constant 0 : i32
    %c0_i32_0 = arith.constant 0 : i32
    %c0_i32_1 = arith.constant 0 : i32
    return %arg0, %c0_i32, %c0_i32_0 : i32, i32, i32
  }
  func.func @transform_3(%arg0: i32) -> (i32, i32, i32) {
    %c0_i32 = arith.constant 0 : i32
    %c0_i32_0 = arith.constant 0 : i32
    %c0_i32_1 = arith.constant 0 : i32
    return %arg0, %c0_i32, %c0_i32_0 : i32, i32, i32
  }
}

module attributes {stable_mosaic.version = 11 : i64} {
  func.func @_ffn_decomp_kernel(%arg0: i32, %arg1: memref<1x16x32xf32, #tpu.memory_space<vmem>>, %arg2: memref<32x32xbf16, #tpu.memory_space<vmem>>, %arg3: memref<32x32xbf16, #tpu.memory_space<vmem>>, %arg4: memref<16x16xbf16, #tpu.memory_space<vmem>>, %arg5: memref<1x16x32xf32, #tpu.memory_space<vmem>>, %arg6: memref<1x16x32xf32, #tpu.memory_space<vmem>>) attributes {dimension_semantics = [#tpu.dimension_semantics<parallel>], iteration_bounds = array<i64: 2>, scalar_prefetch = 0 : i64, scratch_operands = 0 : i64, tpu.core_type = #tpu.core_type<tc>, window_params = [{transform_indices = @transform_0, window_bounds = array<i64: 1, 16, 32>}, {pipeline_mode = #tpu.pipeline_mode<synchronous>, transform_indices = @transform_1, window_bounds = array<i64: 32, 32>}, {pipeline_mode = #tpu.pipeline_mode<synchronous>, transform_indices = @transform_2, window_bounds = array<i64: 32, 32>}, {pipeline_mode = #tpu.pipeline_mode<synchronous>, transform_indices = @transform_3, window_bounds = array<i64: 16, 16>}, {transform_indices = @transform_4, window_bounds = array<i64: 1, 16, 32>}, {transform_indices = @transform_5, window_bounds = array<i64: 1, 16, 32>}]} {
    %c0 = arith.constant 0 : index
    %c0_0 = arith.constant 0 : index
    %c0_1 = arith.constant 0 : index
    %0 = vector.load %arg1[%c0, %c0_0, %c0_1] : memref<1x16x32xf32, #tpu.memory_space<vmem>>, vector<1x16x32xf32>
    %1 = vector.shape_cast %0 : vector<1x16x32xf32> to vector<16x32xf32>
    %2 = arith.truncf %1 : vector<16x32xf32> to vector<16x32xbf16>
    %c0_2 = arith.constant 0 : index
    %c0_3 = arith.constant 0 : index
    %3 = vector.load %arg2[%c0_2, %c0_3] : memref<32x32xbf16, #tpu.memory_space<vmem>>, vector<32x32xbf16>
    %cst = arith.constant dense<0.000000e+00> : vector<16x32xf32>
    %4 = tpu.matmul %2, %3, %cst {dimension_numbers = #tpu.dot_dimension_numbers<[1], [0], [0], [1], [0, 0, 1, 1], [], []>} : vector<16x32xbf16>, vector<32x32xbf16>, vector<16x32xf32> -> vector<16x32xf32>
    %cst_4 = arith.constant 0.000000e+00 : f32
    %5 = vector.broadcast %cst_4 : f32 to vector<16x32xf32>
    %6 = arith.maximumf %4, %5 : vector<16x32xf32>
    %7 = arith.truncf %6 : vector<16x32xf32> to vector<16x32xbf16>
    %c0_5 = arith.constant 0 : index
    %c0_6 = arith.constant 0 : index
    %8 = vector.load %arg3[%c0_5, %c0_6] : memref<32x32xbf16, #tpu.memory_space<vmem>>, vector<32x32xbf16>
    %cst_7 = arith.constant dense<0.000000e+00> : vector<16x32xf32>
    %9 = tpu.matmul %7, %8, %cst_7 {dimension_numbers = #tpu.dot_dimension_numbers<[1], [0], [0], [1], [0, 0, 1, 1], [], []>} : vector<16x32xbf16>, vector<32x32xbf16>, vector<16x32xf32> -> vector<16x32xf32>
    %10 = arith.addf %1, %9 : vector<16x32xf32>
    %c0_8 = arith.constant 0 : index
    %c0_9 = arith.constant 0 : index
    %11 = vector.load %arg4[%c0_8, %c0_9] : memref<16x16xbf16, #tpu.memory_space<vmem>>, vector<16x16xbf16>
    %12 = arith.truncf %10 : vector<16x32xf32> to vector<16x32xbf16>
    %cst_10 = arith.constant dense<0.000000e+00> : vector<16x32xf32>
    %13 = tpu.matmul %11, %12, %cst_10 {dimension_numbers = #tpu.dot_dimension_numbers<[1], [0], [0], [1], [0, 0, 1, 1], [], []>} : vector<16x16xbf16>, vector<16x32xbf16>, vector<16x32xf32> -> vector<16x32xf32>
    %14 = arith.subf %10, %13 : vector<16x32xf32>
    %c0_11 = arith.constant 0 : index
    %c0_12 = arith.constant 0 : index
    %c0_13 = arith.constant 0 : index
    %15 = vector.load %arg5[%c0_11, %c0_12, %c0_13] : memref<1x16x32xf32, #tpu.memory_space<vmem>>, vector<1x16x32xf32>
    %16 = vector.shape_cast %15 : vector<1x16x32xf32> to vector<16x32xf32>
    %17 = vector.shape_cast %14 : vector<16x32xf32> to vector<1x16x32xf32>
    tpu.vector_store %arg5[%c0_11, %c0_12, %c0_13], %17 {strides = array<i32>} : memref<1x16x32xf32, #tpu.memory_space<vmem>>, vector<1x16x32xf32>,
    %c0_14 = arith.constant 0 : index
    %c0_15 = arith.constant 0 : index
    %c0_16 = arith.constant 0 : index
    %18 = vector.load %arg6[%c0_14, %c0_15, %c0_16] : memref<1x16x32xf32, #tpu.memory_space<vmem>>, vector<1x16x32xf32>
    %19 = vector.shape_cast %18 : vector<1x16x32xf32> to vector<16x32xf32>
    %20 = vector.shape_cast %13 : vector<16x32xf32> to vector<1x16x32xf32>
    tpu.vector_store %arg6[%c0_14, %c0_15, %c0_16], %20 {strides = array<i32>} : memref<1x16x32xf32, #tpu.memory_space<vmem>>, vector<1x16x32xf32>,
    return
  }
  func.func @transform_0(%arg0: i32) -> (i32, i32, i32) {
    %c0_i32 = arith.constant 0 : i32
    %c0_i32_0 = arith.constant 0 : i32
    %c0_i32_1 = arith.constant 0 : i32
    return %arg0, %c0_i32, %c0_i32_0 : i32, i32, i32
  }
  func.func @transform_1(%arg0: i32) -> (i32, i32) {
    %c0_i32 = arith.constant 0 : i32
    %c0_i32_0 = arith.constant 0 : i32
    %c0_i32_1 = arith.constant 0 : i32
    return %c0_i32, %c0_i32_0 : i32, i32
  }
  func.func @transform_2(%arg0: i32) -> (i32, i32) {
    %c0_i32 = arith.constant 0 : i32
    %c0_i32_0 = arith.constant 0 : i32
    %c0_i32_1 = arith.constant 0 : i32
    return %c0_i32, %c0_i32_0 : i32, i32
  }
  func.func @transform_3(%arg0: i32) -> (i32, i32) {
    %c0_i32 = arith.constant 0 : i32
    %c0_i32_0 = arith.constant 0 : i32
    %c0_i32_1 = arith.constant 0 : i32
    return %c0_i32, %c0_i32_0 : i32, i32
  }
  func.func @transform_4(%arg0: i32) -> (i32, i32, i32) {
    %c0_i32 = arith.constant 0 : i32
    %c0_i32_0 = arith.constant 0 : i32
    %c0_i32_1 = arith.constant 0 : i32
    return %arg0, %c0_i32, %c0_i32_0 : i32, i32, i32
  }
  func.func @transform_5(%arg0: i32) -> (i32, i32, i32) {
    %c0_i32 = arith.constant 0 : i32
    %c0_i32_0 = arith.constant 0 : i32
    %c0_i32_1 = arith.constant 0 : i32
    return %arg0, %c0_i32, %c0_i32_0 : i32, i32, i32
  }
}

module attributes {stable_mosaic.version = 11 : i64} {
  func.func @_linear_kernel(%arg0: i32, %arg1: memref<16x96xbf16, #tpu.memory_space<vmem>>, %arg2: memref<96x4xbf16, #tpu.memory_space<vmem>>, %arg3: memref<1x4xf32, #tpu.memory_space<vmem>>, %arg4: memref<16x4xf32, #tpu.memory_space<vmem>>) attributes {dimension_semantics = [#tpu.dimension_semantics<parallel>], iteration_bounds = array<i64: 2>, scalar_prefetch = 0 : i64, scratch_operands = 0 : i64, tpu.core_type = #tpu.core_type<tc>, window_params = [{transform_indices = @transform_0, window_bounds = array<i64: 16, 96>}, {pipeline_mode = #tpu.pipeline_mode<synchronous>, transform_indices = @transform_1, window_bounds = array<i64: 96, 4>}, {pipeline_mode = #tpu.pipeline_mode<synchronous>, transform_indices = @transform_2, window_bounds = array<i64: 1, 4>}, {transform_indices = @transform_3, window_bounds = array<i64: 16, 4>}]} {
    %c0 = arith.constant 0 : index
    %c0_0 = arith.constant 0 : index
    %0 = vector.load %arg1[%c0, %c0_0] : memref<16x96xbf16, #tpu.memory_space<vmem>>, vector<16x96xbf16>
    %c0_1 = arith.constant 0 : index
    %c0_2 = arith.constant 0 : index
    %1 = vector.load %arg2[%c0_1, %c0_2] : memref<96x4xbf16, #tpu.memory_space<vmem>>, vector<96x4xbf16>
    %cst = arith.constant dense<0.000000e+00> : vector<16x4xf32>
    %2 = tpu.matmul %0, %1, %cst {dimension_numbers = #tpu.dot_dimension_numbers<[1], [0], [0], [1], [0, 0, 1, 1], [], []>} : vector<16x96xbf16>, vector<96x4xbf16>, vector<16x4xf32> -> vector<16x4xf32>
    %c0_3 = arith.constant 0 : index
    %c0_4 = arith.constant 0 : index
    %3 = vector.load %arg3[%c0_3, %c0_4] : memref<1x4xf32, #tpu.memory_space<vmem>>, vector<1x4xf32>
    %4 = vector.broadcast %3 : vector<1x4xf32> to vector<16x4xf32>
    %5 = arith.addf %2, %4 : vector<16x4xf32>
    %c0_5 = arith.constant 0 : index
    %c0_6 = arith.constant 0 : index
    %6 = vector.load %arg4[%c0_5, %c0_6] : memref<16x4xf32, #tpu.memory_space<vmem>>, vector<16x4xf32>
    tpu.vector_store %arg4[%c0_5, %c0_6], %5 {strides = array<i32>} : memref<16x4xf32, #tpu.memory_space<vmem>>, vector<16x4xf32>,
    return
  }
  func.func @transform_0(%arg0: i32) -> (i32, i32) {
    %c0_i32 = arith.constant 0 : i32
    %c0_i32_0 = arith.constant 0 : i32
    return %arg0, %c0_i32 : i32, i32
  }
  func.func @transform_1(%arg0: i32) -> (i32, i32) {
    %c0_i32 = arith.constant 0 : i32
    %c0_i32_0 = arith.constant 0 : i32
    %c0_i32_1 = arith.constant 0 : i32
    return %c0_i32, %c0_i32_0 : i32, i32
  }
  func.func @transform_2(%arg0: i32) -> (i32, i32) {
    %c0_i32 = arith.constant 0 : i32
    %c0_i32_0 = arith.constant 0 : i32
    %c0_i32_1 = arith.constant 0 : i32
    return %c0_i32, %c0_i32_0 : i32, i32
  }
  func.func @transform_3(%arg0: i32) -> (i32, i32) {
    %c0_i32 = arith.constant 0 : i32
    %c0_i32_0 = arith.constant 0 : i32
    return %arg0, %c0_i32 : i32, i32
  }
}

module attributes {stable_mosaic.version = 11 : i64} {
  func.func @_ln_proj_trend_kernel(%arg0: i32, %arg1: memref<1x16x32xf32, #tpu.memory_space<vmem>>, %arg2: memref<1x32xf32, #tpu.memory_space<vmem>>, %arg3: memref<1x32xf32, #tpu.memory_space<vmem>>, %arg4: memref<32x4xbf16, #tpu.memory_space<vmem>>, %arg5: memref<1x4xf32, #tpu.memory_space<vmem>>, %arg6: memref<1x16x4xf32, #tpu.memory_space<vmem>>, %arg7: memref<1x16x4xf32, #tpu.memory_space<vmem>>) attributes {dimension_semantics = [#tpu.dimension_semantics<parallel>], iteration_bounds = array<i64: 2>, scalar_prefetch = 0 : i64, scratch_operands = 0 : i64, tpu.core_type = #tpu.core_type<tc>, window_params = [{transform_indices = @transform_0, window_bounds = array<i64: 1, 16, 32>}, {pipeline_mode = #tpu.pipeline_mode<synchronous>, transform_indices = @transform_1, window_bounds = array<i64: 1, 32>}, {pipeline_mode = #tpu.pipeline_mode<synchronous>, transform_indices = @transform_2, window_bounds = array<i64: 1, 32>}, {pipeline_mode = #tpu.pipeline_mode<synchronous>, transform_indices = @transform_3, window_bounds = array<i64: 32, 4>}, {pipeline_mode = #tpu.pipeline_mode<synchronous>, transform_indices = @transform_4, window_bounds = array<i64: 1, 4>}, {transform_indices = @transform_5, window_bounds = array<i64: 1, 16, 4>}, {transform_indices = @transform_6, window_bounds = array<i64: 1, 16, 4>}]} {
    %c0 = arith.constant 0 : index
    %c0_0 = arith.constant 0 : index
    %c0_1 = arith.constant 0 : index
    %0 = vector.load %arg1[%c0, %c0_0, %c0_1] : memref<1x16x32xf32, #tpu.memory_space<vmem>>, vector<1x16x32xf32>
    %1 = vector.shape_cast %0 : vector<1x16x32xf32> to vector<16x32xf32>
    %cst = arith.constant dense<0.000000e+00> : vector<16xf32>
    %2 = vector.multi_reduction <add>, %1, %cst [1] : vector<16x32xf32> to vector<16xf32>
    %3 = vector.shape_cast %2 : vector<16xf32> to vector<16x1xf32>
    %cst_2 = arith.constant 3.200000e+01 : f32
    %4 = vector.broadcast %cst_2 : f32 to vector<16x1xf32>
    %5 = arith.divf %3, %4 : vector<16x1xf32>
    %6 = vector.broadcast %5 : vector<16x1xf32> to vector<16x32xf32>
    %7 = arith.subf %1, %6 : vector<16x32xf32>
    %8 = arith.mulf %7, %7 : vector<16x32xf32>
    %cst_3 = arith.constant dense<0.000000e+00> : vector<16xf32>
    %9 = vector.multi_reduction <add>, %8, %cst_3 [1] : vector<16x32xf32> to vector<16xf32>
    %10 = vector.shape_cast %9 : vector<16xf32> to vector<16x1xf32>
    %cst_4 = arith.constant 3.200000e+01 : f32
    %11 = vector.broadcast %cst_4 : f32 to vector<16x1xf32>
    %12 = arith.divf %10, %11 : vector<16x1xf32>
    %13 = vector.broadcast %5 : vector<16x1xf32> to vector<16x32xf32>
    %14 = arith.subf %1, %13 : vector<16x32xf32>
    %cst_5 = arith.constant 9.99999974E-6 : f32
    %15 = vector.broadcast %cst_5 : f32 to vector<16x1xf32>
    %16 = arith.addf %12, %15 : vector<16x1xf32>
    %17 = math.rsqrt %16 : vector<16x1xf32>
    %18 = vector.broadcast %17 : vector<16x1xf32> to vector<16x32xf32>
    %19 = arith.mulf %14, %18 : vector<16x32xf32>
    %c0_6 = arith.constant 0 : index
    %c0_7 = arith.constant 0 : index
    %20 = vector.load %arg2[%c0_6, %c0_7] : memref<1x32xf32, #tpu.memory_space<vmem>>, vector<1x32xf32>
    %21 = vector.shape_cast %20 : vector<1x32xf32> to vector<32xf32>
    %22 = vector.shape_cast %21 : vector<32xf32> to vector<1x32xf32>
    %23 = vector.broadcast %22 : vector<1x32xf32> to vector<16x32xf32>
    %24 = arith.mulf %19, %23 : vector<16x32xf32>
    %c0_8 = arith.constant 0 : index
    %c0_9 = arith.constant 0 : index
    %25 = vector.load %arg3[%c0_8, %c0_9] : memref<1x32xf32, #tpu.memory_space<vmem>>, vector<1x32xf32>
    %26 = vector.shape_cast %25 : vector<1x32xf32> to vector<32xf32>
    %27 = vector.shape_cast %26 : vector<32xf32> to vector<1x32xf32>
    %28 = vector.broadcast %27 : vector<1x32xf32> to vector<16x32xf32>
    %29 = arith.addf %24, %28 : vector<16x32xf32>
    %cst_10 = arith.constant dense<0.000000e+00> : vector<32xf32>
    %30 = vector.multi_reduction <add>, %29, %cst_10 [0] : vector<16x32xf32> to vector<32xf32>
    %31 = vector.shape_cast %30 : vector<32xf32> to vector<1x32xf32>
    %cst_11 = arith.constant 1.600000e+01 : f32
    %32 = vector.broadcast %cst_11 : f32 to vector<1x32xf32>
    %33 = arith.divf %31, %32 : vector<1x32xf32>
    %34 = vector.broadcast %33 : vector<1x32xf32> to vector<16x32xf32>
    %35 = arith.subf %29, %34 : vector<16x32xf32>
    %36 = arith.truncf %35 : vector<16x32xf32> to vector<16x32xbf16>
    %c0_12 = arith.constant 0 : index
    %c0_13 = arith.constant 0 : index
    %37 = vector.load %arg4[%c0_12, %c0_13] : memref<32x4xbf16, #tpu.memory_space<vmem>>, vector<32x4xbf16>
    %cst_14 = arith.constant dense<0.000000e+00> : vector<16x4xf32>
    %38 = tpu.matmul %36, %37, %cst_14 {dimension_numbers = #tpu.dot_dimension_numbers<[1], [0], [0], [1], [0, 0, 1, 1], [], []>} : vector<16x32xbf16>, vector<32x4xbf16>, vector<16x4xf32> -> vector<16x4xf32>
    %c0_15 = arith.constant 0 : index
    %c0_16 = arith.constant 0 : index
    %39 = vector.load %arg5[%c0_15, %c0_16] : memref<1x4xf32, #tpu.memory_space<vmem>>, vector<1x4xf32>
    %40 = vector.shape_cast %39 : vector<1x4xf32> to vector<4xf32>
    %41 = vector.shape_cast %40 : vector<4xf32> to vector<1x4xf32>
    %42 = vector.broadcast %41 : vector<1x4xf32> to vector<16x4xf32>
    %43 = arith.addf %38, %42 : vector<16x4xf32>
    %c0_17 = arith.constant 0 : index
    %c0_18 = arith.constant 0 : index
    %c0_19 = arith.constant 0 : index
    %44 = vector.load %arg6[%c0_17, %c0_18, %c0_19] : memref<1x16x4xf32, #tpu.memory_space<vmem>>, vector<1x16x4xf32>
    %45 = vector.shape_cast %44 : vector<1x16x4xf32> to vector<16x4xf32>
    %46 = arith.addf %43, %45 : vector<16x4xf32>
    %c0_20 = arith.constant 0 : index
    %c0_21 = arith.constant 0 : index
    %c0_22 = arith.constant 0 : index
    %47 = vector.load %arg7[%c0_20, %c0_21, %c0_22] : memref<1x16x4xf32, #tpu.memory_space<vmem>>, vector<1x16x4xf32>
    %48 = vector.shape_cast %47 : vector<1x16x4xf32> to vector<16x4xf32>
    %49 = vector.shape_cast %46 : vector<16x4xf32> to vector<1x16x4xf32>
    tpu.vector_store %arg7[%c0_20, %c0_21, %c0_22], %49 {strides = array<i32>} : memref<1x16x4xf32, #tpu.memory_space<vmem>>, vector<1x16x4xf32>,
    return
  }
  func.func @transform_0(%arg0: i32) -> (i32, i32, i32) {
    %c0_i32 = arith.constant 0 : i32
    %c0_i32_0 = arith.constant 0 : i32
    %c0_i32_1 = arith.constant 0 : i32
    return %arg0, %c0_i32, %c0_i32_0 : i32, i32, i32
  }
  func.func @transform_1(%arg0: i32) -> (i32, i32) {
    %c0_i32 = arith.constant 0 : i32
    %c0_i32_0 = arith.constant 0 : i32
    %c0_i32_1 = arith.constant 0 : i32
    return %c0_i32, %c0_i32_0 : i32, i32
  }
  func.func @transform_2(%arg0: i32) -> (i32, i32) {
    %c0_i32 = arith.constant 0 : i32
    %c0_i32_0 = arith.constant 0 : i32
    %c0_i32_1 = arith.constant 0 : i32
    return %c0_i32, %c0_i32_0 : i32, i32
  }
  func.func @transform_3(%arg0: i32) -> (i32, i32) {
    %c0_i32 = arith.constant 0 : i32
    %c0_i32_0 = arith.constant 0 : i32
    %c0_i32_1 = arith.constant 0 : i32
    return %c0_i32, %c0_i32_0 : i32, i32
  }
  func.func @transform_4(%arg0: i32) -> (i32, i32) {
    %c0_i32 = arith.constant 0 : i32
    %c0_i32_0 = arith.constant 0 : i32
    %c0_i32_1 = arith.constant 0 : i32
    return %c0_i32, %c0_i32_0 : i32, i32
  }
  func.func @transform_5(%arg0: i32) -> (i32, i32, i32) {
    %c0_i32 = arith.constant 0 : i32
    %c0_i32_0 = arith.constant 0 : i32
    %c0_i32_1 = arith.constant 0 : i32
    return %arg0, %c0_i32, %c0_i32_0 : i32, i32, i32
  }
  func.func @transform_6(%arg0: i32) -> (i32, i32, i32) {
    %c0_i32 = arith.constant 0 : i32
    %c0_i32_0 = arith.constant 0 : i32
    %c0_i32_1 = arith.constant 0 : i32
    return %arg0, %c0_i32, %c0_i32_0 : i32, i32, i32
  }
}

</mosaic_0001>

<bundles_post_ra>
// kernel: reverse.11
= control target key start
LH: loop header
LB: loop body
LE: loop exit
PB: predicated region body
PF: predicated region fallthrough
CT: control target
= control target key end

     0   :  { %v2_v0 = vlaneseq  ;;  %s240_s0 = inlined_call_operand.vmem [shape: f32[2,4,8,7], index: 0, kind: input, shape index: {}]   ;;  %s241_s1 = inlined_call_operand.vmem [shape: f32[2,4,8,7], index: 1, kind: output, shape index: {}]  }
   0x1   :  { %v51_v2 = vld [vmem:[%s240_s0 + $0x10] sm:$0xff]  ;;  %v47_v3 = vld [vmem:[%s240_s0] sm:$0xff]  ;;  %v53_v4 = vld [vmem:[%s240_s0 + $0x18] sm:$0xff] }
   0x2   :  { %v3_v1 = vsub.s32 6, %v2_v0  ;;  %v49_v5 = vld [vmem:[%s240_s0 + $0x8] sm:$0xff]  ;;  %v55_v7 = vld [vmem:[%s240_s0 + $0x20] sm:$0xff]  ;;  %v61_v8 = vld [vmem:[%s240_s0 + $0x38] sm:$0xff] }
   0x3   :  { %v57_v6 = vld [vmem:[%s240_s0 + $0x28] sm:$0xff]  ;;  %v59_v9 = vld [vmem:[%s240_s0 + $0x30] sm:$0xff] }
   0x4   :  { %4 = vset.pattern.permute.xlu0 %v3_v1  ;;  %181 = vset.pattern.permute.xlu1 %v3_v1 }
   0x5   :  { %79 = vperm.xlu1 %181, %v51_v2   ;;  %67 = vperm.xlu0 %4, %v47_v3  }
   0x9   :  { %85 = vperm.xlu1 %181, %v53_v4   ;;  %73 = vperm.xlu0 %4, %v49_v5  }
   0xd   :  { %97 = vperm.xlu1 %181, %v57_v6   ;;  %91 = vperm.xlu0 %4, %v55_v7  }
  0x11   :  { %109 = vperm.xlu1 %181, %v61_v8   ;;  %103 = vperm.xlu0 %4, %v59_v9  }
  0x80   :  { %v80_v10 = vpop.permute.xlu1 %79  ;;  %v68_v11 = vpop.permute.xlu0 %67 }
  0x81   :  { %159 = vst [vmem:[%s241_s1 + $0x10] sm:$0xff] %v80_v10  ;;  %155 = vst [vmem:[%s241_s1] sm:$0xff] %v68_v11 }
  0x84   :  { %v86_v12 = vpop.permute.xlu1 %85  ;;  %v74_v13 = vpop.permute.xlu0 %73 }
  0x85   :  { %161 = vst [vmem:[%s241_s1 + $0x18] sm:$0xff] %v86_v12  ;;  %157 = vst [vmem:[%s241_s1 + $0x8] sm:$0xff] %v74_v13 }
  0x88   :  { %v98_v14 = vpop.permute.xlu1 %97  ;;  %v92_v15 = vpop.permute.xlu0 %91 }
  0x89   :  { %165 = vst [vmem:[%s241_s1 + $0x28] sm:$0xff] %v98_v14  ;;  %163 = vst [vmem:[%s241_s1 + $0x20] sm:$0xff] %v92_v15 }
  0x8c   :  { %v110_v16 = vpop.permute.xlu1 %109  ;;  %v104_v17 = vpop.permute.xlu0 %103 }
  0x8d   :  { %169 = vst [vmem:[%s241_s1 + $0x38] sm:$0xff] %v110_v16  ;;  %167 = vst [vmem:[%s241_s1 + $0x30] sm:$0xff] %v104_v17 }

// kernel: autoformer_forward.23
= control target key start
LH: loop header
LB: loop body
LE: loop exit
PB: predicated region body
PF: predicated region fallthrough
CT: control target
= control target key end

     0   :  { %s366_s12 = smov 0   ;;  %s389_s0 = inlined_call_operand.vmem [shape: bf16[32,16], index: 0, kind: input, shape index: {}]   ;;  %s390_s1 = inlined_call_operand.vmem [shape: bf16[16,32], index: 1, kind: input, shape index: {}]   ;;  %s391_s2 = inlined_call_operand.vmem [shape: f32[1,32], index: 2, kind: input, shape index: {}]   ;;  %s392_s3 = inlined_call_operand.vmem [shape: f32[32,32], index: 3, kind: output, shape index: {}]  }
   0x1 LB: > { %s301_s13 = sadd.s32 4294967295, %s342_s12   ;;  %p305_p0 = scmp.ge.s32.totalorder %s342_s12, 1  ;;  %s342_s12 = sphi %s366_s12, %s13_s12  }
   0x2   : > { %p138_p1 = scmp.lt.s32.totalorder %s342_s12, 3 }
   0x4   : > { %p139_p2 = pnand %p305_p0, %p138_p1 }
   0x5   : > { %s306_s16 = sshll.u32 (!%p139_p2), %s301_s13, 1 }
   0x6   : > { %142 = sbr.rel (%p139_p2) target bundleno = 216 (0xd8), region = 32  ;;  %p163_p3 = scmp.lt.s32.totalorder (!%p139_p2), %s306_s16, 3 }
   0xb   : > { %v334_v0 = vld [vmem:[%s390_s1] sm:$0xff]   ;;  %v344_v1 = vmov 0.0   ;;  %vm345_vm0 = vmmov 0   ;;  %s394_s16 = smov (!%p163_p3, %s306_s16), 3  ;;  %vm197_vm1 = vcmask 130048   ;;  %vm242_vm2 = vcmask 261120  }
   0xc   : > { %318 = vmatprep.subr.bf16.mxu0 %v344_v1  ;;  %320 = vmatprep.mubr.msk.bf16.mxu0 %vm345_vm0, %v344_v1  ;;  %s307_s17 = sshll.u32 %s394_s16, 2  ;;  %s309_s21 = sshll.u32 %s394_s16, 3  ;;  %v310_v3 = vld [vmem:[%s391_s2] ss:$0 sm:$0xff] }
   0xd   : > { %319 = vmatpush3.bf16.msra.mxu0 %v334_v0  ;;  %s166_s20 = scalar_lea.vmem %s389_s0, %s307_s17  ;;  %s172_s26 = scalar_lea.vmem %s392_s3, %s309_s21 }
   0xe   : > { %v335_v2 = vld [vmem:[%s166_s20] sm:$0xff]  }
  0x10   : > { %321 = vmatmul.mubr.msk.bf16.vlgmr.msra.gmra.mxu0 %vm197_vm1, %v335_v2 }
  0xd0   : > { %v235_v4 = vpop.f32.mrf.mxu0 }
  0xd1   : > { %v236_v5 = vadd.f32 %v310_v3, %v235_v4 }
  0xd2   : > { %v322_v6 = vpop.f32.mrf.mxu0 }
  0xd3   : > { %243 = vst.msk [vmem:[%s172_s26] sm:$0xff] %vm242_vm2, %v236_v5 }
  0xd4   : > { %v238_v7 = vpop.f32.mrf.mxu0 }
  0xd5   : > { %v239_v8 = vadd.f32 %v310_v3, %v238_v7 }
  0xd6   : > { %v323_v9 = vpop.f32.mrf.mxu0 }
  0xd7   : > { %244 = vst.msk [vmem:[%s172_s26 + $0x8] sm:$0xff] %vm242_vm2, %v239_v8 }
  0xd8 PF: > { %s13_s12 = sadd.s32 1, %s342_s12  }
  0xd9   : > { %p10_p4 = scmp.ge.s32.totalorder %s13_s12, 4  }
  0xdb   :  { %12 = sbr.rel (!%p10_p4) target bundleno = 1 (0x1), region = 62 }

// kernel: autoformer_forward.24
= control target key start
LH: loop header
LB: loop body
LE: loop exit
PB: predicated region body
PF: predicated region fallthrough
CT: control target
= control target key end

     0   :  { %s379_s12 = smov 0   ;;  %s405_s0 = inlined_call_operand.vmem [shape: bf16[32,32], index: 0, kind: input, shape index: {}]   ;;  %s406_s1 = inlined_call_operand.vmem [shape: bf16[32,96], index: 1, kind: input, shape index: {}]   ;;  %s407_s2 = inlined_call_operand.vmem [shape: f32[1,96], index: 2, kind: input, shape index: {}]   ;;  %s408_s3 = inlined_call_operand.vmem [shape: f32[32,96], index: 3, kind: output, shape index: {}]  }
   0x1 LB: > { %s309_s13 = sadd.s32 4294967295, %s355_s12   ;;  %p313_p0 = scmp.ge.s32.totalorder %s355_s12, 1  ;;  %s355_s12 = sphi %s379_s12, %s13_s12  }
   0x2   : > { %p138_p1 = scmp.lt.s32.totalorder %s355_s12, 3 }
   0x4   : > { %p139_p2 = pnand %p313_p0, %p138_p1 }
   0x5   : > { %s314_s18 = sshll.u32 (!%p139_p2), %s309_s13, 1 }
   0x6   : > { %142 = sbr.rel (%p139_p2) target bundleno = 220 (0xdc), region = 32  ;;  %p163_p3 = scmp.lt.s32.totalorder (!%p139_p2), %s314_s18, 3 }
   0xb   : > { %v346_v0 = vld [vmem:[%s406_s1 + $0x8] sm:$0xff]   ;;  %v357_v1 = vmov 0.0   ;;  %v347_v2 = vld [vmem:[%s406_s1] sm:$0xff]   ;;  %vm358_vm0 = vmmov 0   ;;  %s410_s18 = smov (!%p163_p3, %s314_s18), 3  ;;  %vm205_vm1 = vcmask 261120  }
   0xc   : > { %328 = vmatprep.subr.bf16.mxu0 %v357_v1  ;;  %332 = vmatprep.mubr.msk.bf16.mxu0 %vm358_vm0, %v357_v1  ;;  %s315_s19 = sshll.u32 %s410_s18, 2  ;;  %s317_s23 = sshll.u32 %s410_s18, 3  ;;  %v318_v4 = vld [vmem:[%s407_s2] ss:$0 sm:$0xff]  ;;  %vm250_vm2 = vcmask 785408  }
   0xd   : > { %329 = vmatpush3.bf16.msra.mxu0 %v346_v0  ;;  %s166_s22 = scalar_lea.vmem %s405_s0, %s315_s19  ;;  %s172_s28 = scalar_lea.vmem %s408_s3, %s317_s23 }
   0xe   : > { %330 = vmatprep.subr.bf16.mxu0 %v357_v1  ;;  %v348_v3 = vld [vmem:[%s166_s22] sm:$0xff]  }
  0x11   : > { %331 = vmatpush3.bf16.msra.mxu0 %v347_v2 }
  0x14   : > { %333 = vmatmul.mubr.msk.bf16.vlgmr.msra.gmra.mxu0 %vm205_vm1, %v348_v3 }
  0xd4   : > { %v243_v5 = vpop.f32.mrf.mxu0 }
  0xd5   : > { %v244_v6 = vadd.f32 %v318_v4, %v243_v5 }
  0xd6   : > { %v334_v7 = vpop.f32.mrf.mxu0 }
  0xd7   : > { %251 = vst.msk [vmem:[%s172_s28] sm:$0xff] %vm250_vm2, %v244_v6 }
  0xd8   : > { %v246_v8 = vpop.f32.mrf.mxu0 }
  0xd9   : > { %v247_v9 = vadd.f32 %v318_v4, %v246_v8 }
  0xda   : > { %v335_v10 = vpop.f32.mrf.mxu0 }
  0xdb   : > { %252 = vst.msk [vmem:[%s172_s28 + $0x8] sm:$0xff] %vm250_vm2, %v247_v9 }
  0xdc PF: > { %s13_s12 = sadd.s32 1, %s355_s12  }
  0xdd   : > { %p10_p4 = scmp.ge.s32.totalorder %s13_s12, 4  }
  0xdf   :  { %12 = sbr.rel (!%p10_p4) target bundleno = 1 (0x1), region = 62 }

// kernel: custom-call.9
= control target key start
LH: loop header
LB: loop body
LE: loop exit
PB: predicated region body
PF: predicated region fallthrough
CT: control target
= control target key end

     0   :  { %s6_s0 = inlined_call_operand.vmem [shape: f32[2,4,8,16], index: 0, kind: output, shape index: {}]  }

// kernel: autoformer_forward.25
= control target key start
LH: loop header
LB: loop body
LE: loop exit
PB: predicated region body
PF: predicated region fallthrough
CT: control target
= control target key end

     0   :  { %s545_s18 = smov 0   ;;  %s580_s0 = inlined_call_operand.vmem [shape: bf16[2,16,32], index: 0, kind: input, shape index: {}]   ;;  %s581_s1 = inlined_call_operand.vmem [shape: bf16[32,32], index: 1, kind: input, shape index: {}]   ;;  %s582_s2 = inlined_call_operand.vmem [shape: f32[1,32], index: 2, kind: input, shape index: {}]   ;;  %s583_s3 = inlined_call_operand.vmem [shape: f32[2,16,32], index: 3, kind: input, shape index: {}]   ;;  %s584_s4 = inlined_call_operand.vmem [shape: bf16[16,16], index: 4, kind: input, shape index: {}]   ;;  %s585_s5 = inlined_call_operand.vmem [shape: f32[2,16,32], index: 5, kind: output, shape index: {}]  }
   0x1 LB: > { %s449_s19 = sadd.s32 4294967295, %s511_s18   ;;  %p453_p0 = scmp.ge.s32.totalorder %s511_s18, 1  ;;  %s511_s18 = sphi %s545_s18, %s15_s18  }
   0x2   : > { %p197_p1 = scmp.lt.s32.totalorder %s511_s18, 3 }
   0x4   : > { %p198_p2 = pnand %p453_p0, %p197_p1 }
   0x5   : > { %p230_p3 = scmp.lt.s32.totalorder (!%p198_p2), %s449_s19, 1 }
   0x6   : > { %201 = sbr.rel (%p198_p2) target bundleno = 426 (0x1aa), region = 40 }
   0xb   : > { %v501_v0 = vld [vmem:[%s581_s1 + $0x8] sm:$0xff]   ;;  %v513_v1 = vmov 0.0   ;;  %v502_v2 = vld [vmem:[%s581_s1] sm:$0xff]   ;;  %vm514_vm0 = vmmov 0   ;;  %s587_s19 = smov (!%p230_p3, %s449_s19), 1  ;;  %vm276_vm1 = vcmask 261120  }
   0xc   : > { %477 = vmatprep.subr.bf16.mxu0 %v513_v1  ;;  %485 = vmatprep.subr.bf16.mxu1 %v513_v1  ;;  %s469_s24 = sshll.u32 %s587_s19, 3  ;;  %s470_s28 = sshll.u32 %s587_s19, 4  ;;  %v460_v4 = vld [vmem:[%s582_s2] ss:$0 sm:$0xff]  ;;  %vm333_vm2 = vcmask 130048  }
   0xd   : > { %478 = vmatpush3.bf16.msra.mxu0 %v501_v0  ;;  %481 = vmatprep.mubr.msk.bf16.mxu0 %vm514_vm0, %v513_v1  ;;  %s234_s27 = scalar_lea.vmem %s580_s0, %s469_s24  ;;  %s239_s8 = scalar_lea.vmem %s583_s3, %s470_s28  ;;  %v504_v16 = vld [vmem:[%s584_s4] sm:$0xff]  }
   0xe   : > { %479 = vmatprep.subr.bf16.mxu0 %v513_v1  ;;  %487 = vmatprep.mubr.msk.bf16.mxu1 %vm514_vm0, %v513_v1  ;;  %v503_v3 = vld [vmem:[%s234_s27] sm:$0xff]   ;;  %v322_v10 = vld [vmem:[%s239_s8 + $0x8] sm:$0xff]  ;;  %s244_s13 = scalar_lea.vmem %s585_s5, %s470_s28 }
   0xf   : > { %v321_v8 = vld [vmem:[%s239_s8] sm:$0xff] }
  0x11   : > { %480 = vmatpush3.bf16.msra.mxu0 %v502_v2 }
  0x14   : > { %482 = vmatmul.mubr.msk.bf16.vlgmr.msra.gmra.mxu0 %vm276_vm1, %v503_v3 }
  0xd4   : > { %v314_v5 = vpop.f32.mrf.mxu0 }
  0xd5   : > { %v315_v7 = vadd.f32 %v460_v4, %v314_v5 }
  0xd6   : > { %v483_v6 = vpop.f32.mrf.mxu0 }
  0xd7   : > { %v323_v13 = vadd.f32 %v321_v8, %v315_v7 }
  0xd8   : > { %v317_v9 = vpop.f32.mrf.mxu0 }
  0xd9   : > { %v318_v11 = vadd.f32 %v460_v4, %v317_v9 }
  0xda   : > { %v484_v12 = vpop.f32.mrf.mxu0 }
  0xdb   : > { %v324_v14 = vadd.f32 %v322_v10, %v318_v11 }
  0xdd   : > { %v327_v15 = vpack.c.bf16 %v324_v14, %v323_v13 }
  0xdf   : > { %486 = vmatpush3.bf16.msra.mxu1 %v327_v15 }
  0xe2   : > { %488 = vmatmul.mubr.msk.bf16.vlgmr.msra.gmra.mxu1 %vm333_vm2, %v504_v16 }
 0x1a2   : > { %v371_v17 = vpop.f32.mrf.mxu1 }
 0x1a3   : > { %v378_v18 = vsub.f32 %v323_v13, %v371_v17 }
 0x1a4   : > { %v489_v19 = vpop.f32.mrf.mxu1 }
 0x1a5   : > { %380 = vst.msk [vmem:[%s244_s13] sm:$0xff] %vm276_vm1, %v378_v18 }
 0x1a6   : > { %v374_v20 = vpop.f32.mrf.mxu1 }
 0x1a7   : > { %v379_v21 = vsub.f32 %v324_v14, %v374_v20 }
 0x1a8   : > { %v490_v22 = vpop.f32.mrf.mxu1 }
 0x1a9   : > { %381 = vst.msk [vmem:[%s244_s13 + $0x8] sm:$0xff] %vm276_vm1, %v379_v21 }
 0x1aa PF: > { %s15_s18 = sadd.s32 1, %s511_s18  }
 0x1ab   : > { %p12_p4 = scmp.ge.s32.totalorder %s15_s18, 4  }
 0x1ad   :  { %14 = sbr.rel (!%p12_p4) target bundleno = 1 (0x1), region = 73 }

// kernel: autoformer_forward.31
= control target key start
LH: loop header
LB: loop body
LE: loop exit
PB: predicated region body
PF: predicated region fallthrough
CT: control target
= control target key end

     0   :  { %s379_s12 = smov 0   ;;  %s405_s0 = inlined_call_operand.vmem [shape: bf16[32,32], index: 0, kind: input, shape index: {}]   ;;  %s406_s1 = inlined_call_operand.vmem [shape: bf16[32,64], index: 1, kind: input, shape index: {}]   ;;  %s407_s2 = inlined_call_operand.vmem [shape: f32[1,64], index: 2, kind: input, shape index: {}]   ;;  %s408_s3 = inlined_call_operand.vmem [shape: f32[32,64], index: 3, kind: output, shape index: {}]  }
   0x1 LB: > { %s309_s13 = sadd.s32 4294967295, %s355_s12   ;;  %p313_p0 = scmp.ge.s32.totalorder %s355_s12, 1  ;;  %s355_s12 = sphi %s379_s12, %s13_s12  }
   0x2   : > { %p138_p1 = scmp.lt.s32.totalorder %s355_s12, 3 }
   0x4   : > { %p139_p2 = pnand %p313_p0, %p138_p1 }
   0x5   : > { %s314_s18 = sshll.u32 (!%p139_p2), %s309_s13, 1 }
   0x6   : > { %142 = sbr.rel (%p139_p2) target bundleno = 220 (0xdc), region = 32  ;;  %p163_p3 = scmp.lt.s32.totalorder (!%p139_p2), %s314_s18, 3 }
   0xb   : > { %v346_v0 = vld [vmem:[%s406_s1 + $0x8] sm:$0xff]   ;;  %v357_v1 = vmov 0.0   ;;  %v347_v2 = vld [vmem:[%s406_s1] sm:$0xff]   ;;  %vm358_vm0 = vmmov 0   ;;  %s410_s18 = smov (!%p163_p3, %s314_s18), 3  ;;  %vm205_vm1 = vcmask 261120  }
   0xc   : > { %328 = vmatprep.subr.bf16.mxu0 %v357_v1  ;;  %332 = vmatprep.mubr.msk.bf16.mxu0 %vm358_vm0, %v357_v1  ;;  %s315_s19 = sshll.u32 %s410_s18, 2  ;;  %s317_s23 = sshll.u32 %s410_s18, 3  ;;  %v318_v4 = vld [vmem:[%s407_s2] ss:$0 sm:$0xff]  ;;  %vm250_vm2 = vcmask 523264  }
   0xd   : > { %329 = vmatpush3.bf16.msra.mxu0 %v346_v0  ;;  %s166_s22 = scalar_lea.vmem %s405_s0, %s315_s19  ;;  %s172_s28 = scalar_lea.vmem %s408_s3, %s317_s23 }
   0xe   : > { %330 = vmatprep.subr.bf16.mxu0 %v357_v1  ;;  %v348_v3 = vld [vmem:[%s166_s22] sm:$0xff]  }
  0x11   : > { %331 = vmatpush3.bf16.msra.mxu0 %v347_v2 }
  0x14   : > { %333 = vmatmul.mubr.msk.bf16.vlgmr.msra.gmra.mxu0 %vm205_vm1, %v348_v3 }
  0xd4   : > { %v243_v5 = vpop.f32.mrf.mxu0 }
  0xd5   : > { %v244_v6 = vadd.f32 %v318_v4, %v243_v5 }
  0xd6   : > { %v334_v7 = vpop.f32.mrf.mxu0 }
  0xd7   : > { %251 = vst.msk [vmem:[%s172_s28] sm:$0xff] %vm250_vm2, %v244_v6 }
  0xd8   : > { %v246_v8 = vpop.f32.mrf.mxu0 }
  0xd9   : > { %v247_v9 = vadd.f32 %v318_v4, %v246_v8 }
  0xda   : > { %v335_v10 = vpop.f32.mrf.mxu0 }
  0xdb   : > { %252 = vst.msk [vmem:[%s172_s28 + $0x8] sm:$0xff] %vm250_vm2, %v247_v9 }
  0xdc PF: > { %s13_s12 = sadd.s32 1, %s355_s12  }
  0xdd   : > { %p10_p4 = scmp.ge.s32.totalorder %s13_s12, 4  }
  0xdf   :  { %12 = sbr.rel (!%p10_p4) target bundleno = 1 (0x1), region = 62 }

// kernel: autoformer_forward.30
= control target key start
LH: loop header
LB: loop body
LE: loop exit
PB: predicated region body
PF: predicated region fallthrough
CT: control target
= control target key end

     0   :  { %s344_s12 = smov 0   ;;  %s382_s0 = inlined_call_operand.vmem [shape: f32[2,16,32], index: 0, kind: input, shape index: {}]   ;;  %s383_s1 = inlined_call_operand.vmem [shape: f32[1,1,32], index: 1, kind: input, shape index: {}]   ;;  %s384_s2 = inlined_call_operand.vmem [shape: f32[1,1,32], index: 2, kind: input, shape index: {}]   ;;  %s385_s3 = inlined_call_operand.vmem [shape: f32[2,16,32], index: 3, kind: output, shape index: {}]  }
   0x1 LB: > { %s289_s13 = sadd.s32 4294967295, %s322_s12   ;;  %p293_p0 = scmp.ge.s32.totalorder %s322_s12, 1  ;;  %s322_s12 = sphi %s344_s12, %s13_s12  }
   0x2   : > { %p137_p1 = scmp.lt.s32.totalorder %s322_s12, 3 }
   0x4   : > { %p138_p2 = pnand %p293_p0, %p137_p1 }
   0x5   : > { %p161_p3 = scmp.lt.s32.totalorder (!%p138_p2), %s289_s13, 1 }
   0x6   : > { %141 = sbr.rel (%p138_p2) target bundleno = 347 (0x15b), region = 32 }
   0xb   : > { %s387_s13 = smov (!%p161_p3, %s289_s13), 1  ;;  %vm173_vm0 = vcmask 261120   ;;  %v298_v21 = vld [vmem:[%s383_s1] ss:$0 sm:$0xff] }
   0xc   : > { %s302_s14 = sshll.u32 %s387_s13, 4  ;;  %v299_v25 = vld [vmem:[%s384_s2] ss:$0 sm:$0xff] }
   0xd   : > { %s165_s17 = scalar_lea.vmem %s382_s0, %s302_s14  ;;  %s170_s24 = scalar_lea.vmem %s385_s3, %s302_s14 }
   0xe   : > { %v171_v0 = vld [vmem:[%s165_s17] sm:$0xff]  ;;  %v172_v1 = vld [vmem:[%s165_s17 + $0x8] sm:$0xff] }
   0xf   : > { %v174_v2 = vsel %vm173_vm0, %v171_v0, 0.0  ;;  %v177_v3 = vsel %vm173_vm0, %v172_v1, 0.0 }
  0x10   : > { %175 = vadd.xlane.f32.xlu0 %v174_v2 }
  0x14   : > { %178 = vadd.xlane.f32.xlu0 %v177_v3 }
  0x99   : > { %v176_v4 = vpop.xlane.xlu0 %175 }
  0x9a   : > { %v181_v5 = vmul.f32 0.03125, %v176_v4 }
  0x9c   : > { %v183_v6 = vsub.f32 %v171_v0, %v181_v5 }
  0x9d   : > { %v179_v7 = vpop.xlane.xlu0 %178 }
  0x9e   : > { %v182_v8 = vmul.f32 0.03125, %v179_v7  ;;  %v185_v9 = vmul.f32 %v183_v6, %v183_v6 }
  0xa0   : > { %v184_v10 = vsub.f32 %v172_v1, %v182_v8  ;;  %v187_v11 = vsel %vm173_vm0, %v185_v9, 0.0 }
  0xa1   : > { %188 = vadd.xlane.f32.xlu1 %v187_v11 }
  0xa2   : > { %v186_v12 = vmul.f32 %v184_v10, %v184_v10 }
  0xa4   : > { %v190_v13 = vsel %vm173_vm0, %v186_v12, 0.0 }
  0xa5   : > { %191 = vadd.xlane.f32.xlu1 %v190_v13 }
 0x12a   : > { %v189_v14 = vpop.xlane.xlu1 %188 }
 0x12b   : > { %v193_v15 = vmul.f32 0.03125, %v189_v14 }
 0x12d   : > { %v195_v16 = vadd.f32 1e-05, %v193_v15 }
 0x12e   : > { %v192_v17 = vpop.xlane.xlu1 %191 }
 0x12f   : > { %312 = vrsqrt.f32 %v195_v16  ;;  %v194_v18 = vmul.f32 0.03125, %v192_v17 }
 0x131   : > { %v196_v19 = vadd.f32 1e-05, %v194_v18 }
 0x133   : > { %314 = vrsqrt.f32 %v196_v19 }
 0x13c   : > { %v313_v20 = vpop.eup %312 }
 0x13d   : > { %v199_v22 = vmul.f32 %v313_v20, %v183_v6 }
 0x13f   : > { %v208_v23 = vmul.f32 %v298_v21, %v199_v22 }
 0x140   : > { %v315_v24 = vpop.eup %314 }
 0x141   : > { %v200_v26 = vmul.f32 %v315_v24, %v184_v10  ;;  %v217_v27 = vadd.f32 %v299_v25, %v208_v23 }
 0x143   : > { %v209_v28 = vmul.f32 %v298_v21, %v200_v26  ;;  %v219_v30 = vsel %vm173_vm0, %v217_v27, 0.0 }
 0x145   : > { %v218_v29 = vadd.f32 %v299_v25, %v209_v28 }
 0x147   : > { %v220_v31 = vsel %vm173_vm0, %v218_v29, 0.0 }
 0x148   : > { %v221_v32 = vadd.f32 %v220_v31, %v219_v30 }
 0x14a   : > { %v222_v33 = vrot.slane %v221_v32, 4 }
 0x14c   : > { %v223_v34 = vadd.f32 %v222_v33, %v221_v32 }
 0x14e   : > { %v224_v35 = vrot.slane %v223_v34, 2 }
 0x150   : > { %v225_v36 = vadd.f32 %v224_v35, %v223_v34 }
 0x152   : > { %v226_v37 = vrot.slane %v225_v36, 1 }
 0x154   : > { %v227_v38 = vadd.f32 %v226_v37, %v225_v36 }
 0x156   : > { %v229_v39 = vmul.f32 0.0625, %v227_v38 }
 0x158   : > { %v230_v40 = vsub.f32 %v217_v27, %v229_v39  ;;  %v231_v41 = vsub.f32 %v218_v29, %v229_v39 }
 0x15a   : > { %232 = vst.msk [vmem:[%s170_s24] sm:$0xff] %vm173_vm0, %v230_v40  ;;  %233 = vst.msk [vmem:[%s170_s24 + $0x8] sm:$0xff] %vm173_vm0, %v231_v41 }
 0x15b PF: > { %s13_s12 = sadd.s32 1, %s322_s12  }
 0x15c   : > { %p10_p4 = scmp.ge.s32.totalorder %s13_s12, 4  }
 0x15e   :  { %12 = sbr.rel (!%p10_p4) target bundleno = 1 (0x1), region = 62 }

// kernel: autoformer_forward.26
= control target key start
LH: loop header
LB: loop body
LE: loop exit
PB: predicated region body
PF: predicated region fallthrough
CT: control target
= control target key end

     0   :  { %s541_s15 = smov 0   ;;  %s584_s0 = inlined_call_operand.vmem [shape: f32[2,16,32], index: 0, kind: input, shape index: {}]   ;;  %s585_s1 = inlined_call_operand.vmem [shape: bf16[32,32], index: 1, kind: input, shape index: {}]   ;;  %s586_s2 = inlined_call_operand.vmem [shape: bf16[32,32], index: 2, kind: input, shape index: {}]   ;;  %s587_s3 = inlined_call_operand.vmem [shape: bf16[16,16], index: 3, kind: input, shape index: {}]   ;;  %s588_s4 = inlined_call_operand.vmem [shape: f32[2,16,32], index: 4, kind: output, shape index: {}]  }
   0x1 LB: > { %s440_s16 = sadd.s32 4294967295, %s512_s15   ;;  %p444_p0 = scmp.ge.s32.totalorder %s512_s15, 1  ;;  %s512_s15 = sphi %s541_s15, %s14_s15  }
   0x2   : > { %p162_p1 = scmp.lt.s32.totalorder %s512_s15, 3 }
   0x4   : > { %p163_p2 = pnand %p444_p0, %p162_p1 }
   0x5   : > { %p188_p3 = scmp.lt.s32.totalorder (!%p163_p2), %s440_s16, 1 }
   0x6   : > { %166 = sbr.rel (%p163_p2) target bundleno = 625 (0x271), region = 36 }
   0xb   : > { %v501_v0 = vld [vmem:[%s585_s1 + $0x8] sm:$0xff]   ;;  %v514_v1 = vmov 0.0   ;;  %v502_v2 = vld [vmem:[%s585_s1] sm:$0xff]   ;;  %vm515_vm0 = vmmov 0   ;;  %s590_s16 = smov (!%p188_p3, %s440_s16), 1  ;;  %vm218_vm1 = vcmask 261120  }
   0xc   : > { %469 = vmatprep.subr.bf16.mxu0 %v514_v1  ;;  %477 = vmatprep.subr.bf16.mxu1 %v514_v1  ;;  %s459_s21 = sshll.u32 %s590_s16, 4  ;;  %v503_v6 = vld [vmem:[%s586_s2 + $0x8] sm:$0xff]   ;;  %v504_v7 = vld [vmem:[%s586_s2] sm:$0xff]   ;;  %vm336_vm2 = vcmask 130048  }
   0xd   : > { %470 = vmatpush3.bf16.msra.mxu0 %v501_v0  ;;  %473 = vmatprep.mubr.msk.bf16.mxu0 %vm515_vm0, %v514_v1  ;;  %s192_s24 = scalar_lea.vmem %s584_s0, %s459_s21  ;;  %v505_v22 = vld [vmem:[%s587_s3] sm:$0xff]   ;;  %s197_s7 = scalar_lea.vmem %s588_s4, %s459_s21 }
   0xe   : > { %471 = vmatprep.subr.bf16.mxu0 %v514_v1  ;;  %481 = vmatprep.mubr.msk.bf16.mxu1 %vm515_vm0, %v514_v1  ;;  %v199_v3 = vld [vmem:[%s192_s24] sm:$0xff]  ;;  %v200_v4 = vld [vmem:[%s192_s24 + $0x8] sm:$0xff] }
   0xf   : > { %v201_v5 = vpack.c.bf16 %v200_v4, %v199_v3  ;;  %478 = vmatpush3.bf16.msra.mxu1 %v503_v6 }
  0x10   : > { %479 = vmatprep.subr.bf16.mxu1 %v514_v1 }
  0x11   : > { %472 = vmatpush3.bf16.msra.mxu0 %v502_v2 }
  0x12   : > { %485 = vmatprep.subr.bf16.mxu0 %v514_v1 }
  0x13   : > { %480 = vmatpush3.bf16.msra.mxu1 %v504_v7 }
  0x14   : > { %474 = vmatmul.mubr.msk.bf16.vlgmr.msra.gmra.mxu0 %vm218_vm1, %v201_v5 }
  0x15   : > { %487 = vmatprep.mubr.msk.bf16.mxu0 %vm515_vm0, %v514_v1 }
  0xd4   : > { %v256_v8 = vpop.f32.mrf.mxu0 }
  0xd5   : > { %v263_v11 = vmax.f32 %v256_v8, 0.0 }
  0xd6   : > { %v475_v9 = vpop.f32.mrf.mxu0 }
  0xd8   : > { %v259_v10 = vpop.f32.mrf.mxu0 }
  0xd9   : > { %v264_v12 = vmax.f32 %v259_v10, 0.0 }
  0xda   : > { %v476_v13 = vpop.f32.mrf.mxu0 }
  0xdb   : > { %v265_v14 = vpack.c.bf16 %v264_v12, %v263_v11 }
  0xdd   : > { %482 = vmatmul.mubr.msk.bf16.vlgmr.msra.gmra.mxu1 %vm218_vm1, %v265_v14 }
 0x19d   : > { %v319_v15 = vpop.f32.mrf.mxu1 }
 0x19e   : > { %v326_v18 = vadd.f32 %v319_v15, %v199_v3 }
 0x19f   : > { %v483_v16 = vpop.f32.mrf.mxu1 }
 0x1a1   : > { %v322_v17 = vpop.f32.mrf.mxu1 }
 0x1a2   : > { %v327_v19 = vadd.f32 %v322_v17, %v200_v4 }
 0x1a3   : > { %v484_v20 = vpop.f32.mrf.mxu1 }
 0x1a4   : > { %v330_v21 = vpack.c.bf16 %v327_v19, %v326_v18 }
 0x1a6   : > { %486 = vmatpush3.bf16.msra.mxu0 %v330_v21 }
 0x1a9   : > { %488 = vmatmul.mubr.msk.bf16.vlgmr.msra.gmra.mxu0 %vm336_vm2, %v505_v22 }
 0x269   : > { %v374_v23 = vpop.f32.mrf.mxu0 }
 0x26a   : > { %v381_v24 = vsub.f32 %v326_v18, %v374_v23 }
 0x26b   : > { %v489_v25 = vpop.f32.mrf.mxu0 }
 0x26c   : > { %383 = vst.msk [vmem:[%s197_s7] sm:$0xff] %vm218_vm1, %v381_v24 }
 0x26d   : > { %v377_v26 = vpop.f32.mrf.mxu0 }
 0x26e   : > { %v382_v27 = vsub.f32 %v327_v19, %v377_v26 }
 0x26f   : > { %v490_v28 = vpop.f32.mrf.mxu0 }
 0x270   : > { %384 = vst.msk [vmem:[%s197_s7 + $0x8] sm:$0xff] %vm218_vm1, %v382_v27 }
 0x271 PF: > { %s14_s15 = sadd.s32 1, %s512_s15  }
 0x272   : > { %p11_p4 = scmp.ge.s32.totalorder %s14_s15, 4  }
 0x274   :  { %13 = sbr.rel (!%p11_p4) target bundleno = 1 (0x1), region = 66 }

// kernel: autoformer_forward.22
= control target key start
LH: loop header
LB: loop body
LE: loop exit
PB: predicated region body
PF: predicated region fallthrough
CT: control target
= control target key end

     0   :  { %s378_s12 = smov 0   ;;  %s404_s0 = inlined_call_operand.vmem [shape: bf16[32,32], index: 0, kind: input, shape index: {}]   ;;  %s405_s1 = inlined_call_operand.vmem [shape: bf16[32,32], index: 1, kind: input, shape index: {}]   ;;  %s406_s2 = inlined_call_operand.vmem [shape: f32[1,32], index: 2, kind: input, shape index: {}]   ;;  %s407_s3 = inlined_call_operand.vmem [shape: f32[32,32], index: 3, kind: output, shape index: {}]  }
   0x1 LB: > { %s308_s13 = sadd.s32 4294967295, %s354_s12   ;;  %p312_p0 = scmp.ge.s32.totalorder %s354_s12, 1  ;;  %s354_s12 = sphi %s378_s12, %s13_s12  }
   0x2   : > { %p138_p1 = scmp.lt.s32.totalorder %s354_s12, 3 }
   0x4   : > { %p139_p2 = pnand %p312_p0, %p138_p1 }
   0x5   : > { %s313_s18 = sshll.u32 (!%p139_p2), %s308_s13, 1 }
   0x6   : > { %142 = sbr.rel (%p139_p2) target bundleno = 220 (0xdc), region = 32  ;;  %p163_p3 = scmp.lt.s32.totalorder (!%p139_p2), %s313_s18, 3 }
   0xb   : > { %v345_v0 = vld [vmem:[%s405_s1 + $0x8] sm:$0xff]   ;;  %v356_v1 = vmov 0.0   ;;  %v346_v2 = vld [vmem:[%s405_s1] sm:$0xff]   ;;  %vm357_vm0 = vmmov 0   ;;  %s409_s18 = smov (!%p163_p3, %s313_s18), 3  ;;  %vm205_vm1 = vcmask 261120  }
   0xc   : > { %327 = vmatprep.subr.bf16.mxu0 %v356_v1  ;;  %331 = vmatprep.mubr.msk.bf16.mxu0 %vm357_vm0, %v356_v1  ;;  %s314_s19 = sshll.u32 %s409_s18, 2  ;;  %s316_s23 = sshll.u32 %s409_s18, 3  ;;  %v317_v4 = vld [vmem:[%s406_s2] ss:$0 sm:$0xff] }
   0xd   : > { %328 = vmatpush3.bf16.msra.mxu0 %v345_v0  ;;  %s166_s22 = scalar_lea.vmem %s404_s0, %s314_s19  ;;  %s172_s28 = scalar_lea.vmem %s407_s3, %s316_s23 }
   0xe   : > { %329 = vmatprep.subr.bf16.mxu0 %v356_v1  ;;  %v347_v3 = vld [vmem:[%s166_s22] sm:$0xff]  }
  0x11   : > { %330 = vmatpush3.bf16.msra.mxu0 %v346_v2 }
  0x14   : > { %332 = vmatmul.mubr.msk.bf16.vlgmr.msra.gmra.mxu0 %vm205_vm1, %v347_v3 }
  0xd4   : > { %v243_v5 = vpop.f32.mrf.mxu0 }
  0xd5   : > { %v244_v6 = vadd.f32 %v317_v4, %v243_v5 }
  0xd6   : > { %v333_v7 = vpop.f32.mrf.mxu0 }
  0xd7   : > { %250 = vst.msk [vmem:[%s172_s28] sm:$0xff] %vm205_vm1, %v244_v6 }
  0xd8   : > { %v246_v8 = vpop.f32.mrf.mxu0 }
  0xd9   : > { %v247_v9 = vadd.f32 %v317_v4, %v246_v8 }
  0xda   : > { %v334_v10 = vpop.f32.mrf.mxu0 }
  0xdb   : > { %251 = vst.msk [vmem:[%s172_s28 + $0x8] sm:$0xff] %vm205_vm1, %v247_v9 }
  0xdc PF: > { %s13_s12 = sadd.s32 1, %s354_s12  }
  0xdd   : > { %p10_p4 = scmp.ge.s32.totalorder %s13_s12, 4  }
  0xdf   :  { %12 = sbr.rel (!%p10_p4) target bundleno = 1 (0x1), region = 62 }

// kernel: autoformer_forward.18
= control target key start
LH: loop header
LB: loop body
LE: loop exit
PB: predicated region body
PF: predicated region fallthrough
CT: control target
= control target key end

     0   :  { %s430_s12 = smov 0   ;;  %s456_s0 = inlined_call_operand.vmem [shape: f32[16,16], index: 0, kind: input, shape index: {}]   ;;  %s457_s1 = inlined_call_operand.vmem [shape: f32[2,16,4], index: 1, kind: input, shape index: {}]   ;;  %s458_s2 = inlined_call_operand.vmem [shape: f32[2,16,4], index: 2, kind: output, shape index: {0}]   ;;  %s459_s3 = inlined_call_operand.vmem [shape: f32[2,16,4], index: 3, kind: output, shape index: {1}]  }
   0x1 LB: > { %s365_s13 = sadd.s32 4294967295, %s408_s12   ;;  %p369_p0 = scmp.ge.s32.totalorder %s408_s12, 1  ;;  %s408_s12 = sphi %s430_s12, %s14_s12  }
   0x2   : > { %p140_p1 = scmp.lt.s32.totalorder %s408_s12, 3 }
   0x4   : > { %p141_p2 = pnand %p369_p0, %p140_p1 }
   0x5   : > { %p169_p3 = scmp.lt.s32.totalorder (!%p141_p2), %s365_s13, 1 }
   0x6   : > { %144 = sbr.rel (%p141_p2) target bundleno = 217 (0xd9), region = 28 }
   0xb   : > { %v186_v0 = vld [vmem:[%s456_s0] sm:$0xff]  ;;  %vm188_vm0 = vcmask 130048   ;;  %s461_s13 = smov (!%p169_p3, %s365_s13), 1  ;;  %v187_v3 = vld [vmem:[%s456_s0 + $0x8] sm:$0xff]  ;;  %vm270_vm1 = vcmask 31744  }
   0xc   : > { %391 = vmatprep.mubr.msk.f32.mxu0 %vm188_vm0, %v186_v0  ;;  %s380_s16 = sshll.u32 %s461_s13, 4 }
   0xd   : > { %s173_s19 = scalar_lea.vmem %s457_s1, %s380_s16  ;;  %s183_s24 = scalar_lea.vmem %s459_s3, %s380_s16 }
   0xe   : > { %v185_v1 = vld [vmem:[%s173_s19 + $0x8] sm:$0xff]  ;;  %v184_v2 = vld [vmem:[%s173_s19] sm:$0xff]  ;;  %s178_s27 = scalar_lea.vmem %s458_s2, %s380_s16 }
   0xf   : > { %387 = vmatprep.subr.mxu0 %v185_v1 }
  0x10   : > { %388 = vmatpush3.msra.mxu0 %v185_v1 }
  0x11   : > { %389 = vmatprep.subr.mxu0 %v184_v2 }
  0x12   : > { %390 = vmatpush3.msra.mxu0 %v184_v2 }
  0x13   : > { %392 = vmatmul.mubr.msk.f32.vlgmr.msra.gmra.mxu0 %vm188_vm0, %v187_v3 }
  0xd3   : > { %v393_v4 = vpop.f32.mrf.mxu0 }
  0xd4   : > { %272 = vst.msk [vmem:[%s183_s24 + $0x8] sm:$0xff] %vm270_vm1, %v393_v4  ;;  %v274_v5 = vsub.f32 %v185_v1, %v393_v4 }
  0xd5   : > { %v261_v6 = vpop.f32.mrf.mxu0 }
  0xd6   : > { %276 = vst.msk [vmem:[%s178_s27 + $0x8] sm:$0xff] %vm270_vm1, %v274_v5  ;;  %271 = vst.msk [vmem:[%s183_s24] sm:$0xff] %vm270_vm1, %v261_v6  ;;  %v273_v7 = vsub.f32 %v184_v2, %v261_v6 }
  0xd8   : > { %275 = vst.msk [vmem:[%s178_s27] sm:$0xff] %vm270_vm1, %v273_v7 }
  0xd9 PF: > { %s14_s12 = sadd.s32 1, %s408_s12  }
  0xda   : > { %p11_p4 = scmp.ge.s32.totalorder %s14_s12, 4  }
  0xdc   :  { %13 = sbr.rel (!%p11_p4) target bundleno = 1 (0x1), region = 70 }

// kernel: autoformer_forward.21
= control target key start
LH: loop header
LB: loop body
LE: loop exit
PB: predicated region body
PF: predicated region fallthrough
CT: control target
= control target key end

     0   :  { %s628_s21 = smov 0   ;;  %s668_s0 = inlined_call_operand.vmem [shape: bf16[2,16,32], index: 0, kind: input, shape index: {}]   ;;  %s669_s1 = inlined_call_operand.vmem [shape: bf16[32,32], index: 1, kind: input, shape index: {}]   ;;  %s670_s2 = inlined_call_operand.vmem [shape: f32[1,32], index: 2, kind: input, shape index: {}]   ;;  %s671_s3 = inlined_call_operand.vmem [shape: f32[2,16,32], index: 3, kind: input, shape index: {}]   ;;  %s672_s4 = inlined_call_operand.vmem [shape: bf16[16,16], index: 4, kind: input, shape index: {}]   ;;  %s673_s5 = inlined_call_operand.vmem [shape: f32[2,16,32], index: 5, kind: output, shape index: {0}]   ;;  %s674_s6 = inlined_call_operand.vmem [shape: f32[2,16,32], index: 6, kind: output, shape index: {1}]  }
   0x1 LB: > { %s524_s22 = sadd.s32 4294967295, %s589_s21   ;;  %p528_p0 = scmp.ge.s32.totalorder %s589_s21, 1  ;;  %s589_s21 = sphi %s628_s21, %s17_s21  }
   0x2   : > { %p225_p1 = scmp.lt.s32.totalorder %s589_s21, 3 }
   0x4   : > { %p226_p2 = pnand %p528_p0, %p225_p1 }
   0x5   : > { %p265_p3 = scmp.lt.s32.totalorder (!%p226_p2), %s524_s22, 1 }
   0x6   : > { %229 = sbr.rel (%p226_p2) target bundleno = 426 (0x1aa), region = 40 }
   0xb   : > { %v579_v0 = vld [vmem:[%s669_s1 + $0x8] sm:$0xff]   ;;  %v591_v1 = vmov 0.0   ;;  %v580_v2 = vld [vmem:[%s669_s1] sm:$0xff]   ;;  %vm592_vm0 = vmmov 0   ;;  %s676_s22 = smov (!%p265_p3, %s524_s22), 1  ;;  %vm316_vm1 = vcmask 261120  }
   0xc   : > { %555 = vmatprep.subr.bf16.mxu0 %v591_v1  ;;  %563 = vmatprep.subr.bf16.mxu1 %v591_v1  ;;  %s546_s27 = sshll.u32 %s676_s22, 3  ;;  %s547_s7 = sshll.u32 %s676_s22, 4  ;;  %v537_v4 = vld [vmem:[%s670_s2] ss:$0 sm:$0xff]  ;;  %vm373_vm2 = vcmask 130048  }
   0xd   : > { %556 = vmatpush3.bf16.msra.mxu0 %v579_v0  ;;  %559 = vmatprep.mubr.msk.bf16.mxu0 %vm592_vm0, %v591_v1  ;;  %s269_s30 = scalar_lea.vmem %s668_s0, %s546_s27  ;;  %s274_s12 = scalar_lea.vmem %s671_s3, %s547_s7  ;;  %v582_v16 = vld [vmem:[%s672_s4] sm:$0xff]  }
   0xe   : > { %557 = vmatprep.subr.bf16.mxu0 %v591_v1  ;;  %565 = vmatprep.mubr.msk.bf16.mxu1 %vm592_vm0, %v591_v1  ;;  %v581_v3 = vld [vmem:[%s269_s30] sm:$0xff]   ;;  %v362_v10 = vld [vmem:[%s274_s12 + $0x8] sm:$0xff]  ;;  %s284_s17 = scalar_lea.vmem %s674_s6, %s547_s7  ;;  %s279_s20 = scalar_lea.vmem %s673_s5, %s547_s7 }
   0xf   : > { %v361_v8 = vld [vmem:[%s274_s12] sm:$0xff] }
  0x11   : > { %558 = vmatpush3.bf16.msra.mxu0 %v580_v2 }
  0x14   : > { %560 = vmatmul.mubr.msk.bf16.vlgmr.msra.gmra.mxu0 %vm316_vm1, %v581_v3 }
  0xd4   : > { %v354_v5 = vpop.f32.mrf.mxu0 }
  0xd5   : > { %v355_v7 = vadd.f32 %v537_v4, %v354_v5 }
  0xd6   : > { %v561_v6 = vpop.f32.mrf.mxu0 }
  0xd7   : > { %v363_v13 = vadd.f32 %v361_v8, %v355_v7 }
  0xd8   : > { %v357_v9 = vpop.f32.mrf.mxu0 }
  0xd9   : > { %v358_v11 = vadd.f32 %v537_v4, %v357_v9 }
  0xda   : > { %v562_v12 = vpop.f32.mrf.mxu0 }
  0xdb   : > { %v364_v14 = vadd.f32 %v362_v10, %v358_v11 }
  0xdd   : > { %v367_v15 = vpack.c.bf16 %v364_v14, %v363_v13 }
  0xdf   : > { %564 = vmatpush3.bf16.msra.mxu1 %v367_v15 }
  0xe2   : > { %566 = vmatmul.mubr.msk.bf16.vlgmr.msra.gmra.mxu1 %vm373_vm2, %v582_v16 }
 0x1a2   : > { %v411_v17 = vpop.f32.mrf.mxu1 }
 0x1a3   : > { %v418_v18 = vsub.f32 %v363_v13, %v411_v17  ;;  %422 = vst.msk [vmem:[%s284_s17] sm:$0xff] %vm316_vm1, %v411_v17 }
 0x1a4   : > { %v567_v19 = vpop.f32.mrf.mxu1 }
 0x1a5   : > { %420 = vst.msk [vmem:[%s279_s20] sm:$0xff] %vm316_vm1, %v418_v18 }
 0x1a6   : > { %v414_v20 = vpop.f32.mrf.mxu1 }
 0x1a7   : > { %v419_v21 = vsub.f32 %v364_v14, %v414_v20  ;;  %423 = vst.msk [vmem:[%s284_s17 + $0x8] sm:$0xff] %vm316_vm1, %v414_v20 }
 0x1a8   : > { %v568_v22 = vpop.f32.mrf.mxu1 }
 0x1a9   : > { %421 = vst.msk [vmem:[%s279_s20 + $0x8] sm:$0xff] %vm316_vm1, %v419_v21 }
 0x1aa PF: > { %s17_s21 = sadd.s32 1, %s589_s21  }
 0x1ab   : > { %p14_p4 = scmp.ge.s32.totalorder %s17_s21, 4  }
 0x1ad   :  { %16 = sbr.rel (!%p14_p4) target bundleno = 1 (0x1), region = 85 }

// kernel: autoformer_forward.34
= control target key start
LH: loop header
LB: loop body
LE: loop exit
PB: predicated region body
PF: predicated region fallthrough
CT: control target
= control target key end

     0   :  { %s431_s12 = smov 0   ;;  %s469_s0 = inlined_call_operand.vmem [shape: bf16[32,96], index: 0, kind: input, shape index: {}]   ;;  %s470_s1 = inlined_call_operand.vmem [shape: bf16[96,4], index: 1, kind: input, shape index: {}]   ;;  %s471_s2 = inlined_call_operand.vmem [shape: f32[1,4], index: 2, kind: input, shape index: {}]   ;;  %s472_s3 = inlined_call_operand.vmem [shape: f32[32,4], index: 3, kind: output, shape index: {}]  }
   0x1 LB: > { %s341_s13 = sadd.s32 4294967295, %s407_s12   ;;  %p345_p0 = scmp.ge.s32.totalorder %s407_s12, 1  ;;  %s407_s12 = sphi %s431_s12, %s13_s12  }
   0x2   : > { %p138_p1 = scmp.lt.s32.totalorder %s407_s12, 3 }
   0x4   : > { %p139_p2 = pnand %p345_p0, %p138_p1 }
   0x5   : > { %s346_s18 = sshll.u32 (!%p139_p2), %s341_s13, 1 }
   0x6   : > { %142 = sbr.rel (%p139_p2) target bundleno = 236 (0xec), region = 32  ;;  %p163_p3 = scmp.lt.s32.totalorder (!%p139_p2), %s346_s18, 3 }
   0xb   : > { %v394_v0 = vld [vmem:[%s470_s1 + $0x28] sm:$0xff]   ;;  %v409_v1 = vmov 0.0   ;;  %v395_v2 = vld [vmem:[%s470_s1 + $0x20] sm:$0xff]   ;;  %vm410_vm0 = vmmov 0   ;;  %s474_s18 = smov (!%p163_p3, %s346_s18), 3  ;;  %v396_v3 = vld [vmem:[%s470_s1 + $0x18] sm:$0xff]  }
   0xc   : > { %368 = vmatprep.subr.bf16.mxu0 %v409_v1  ;;  %380 = vmatprep.mubr.msk.bf16.mxu0 %vm410_vm0, %v409_v1  ;;  %s347_s21 = sshll.u32 %s474_s18, 2  ;;  %v397_v4 = vld [vmem:[%s470_s1 + $0x10] sm:$0xff]   ;;  %v398_v5 = vld [vmem:[%s470_s1 + $0x8] sm:$0xff]   ;;  %v399_v6 = vld [vmem:[%s470_s1] sm:$0xff]   ;;  %vm237_vm1 = vcmask 785408   ;;  %s349_s4 = sshll.u32 %s474_s18, 3 }
   0xd   : > { %369 = vmatpush3.bf16.msra.mxu0 %v394_v0  ;;  %s166_s24 = scalar_lea.vmem %s469_s0, %s347_s21  ;;  %v350_v8 = vld [vmem:[%s471_s2] ss:$0 sm:$0xff]  ;;  %s172_s9 = scalar_lea.vmem %s472_s3, %s349_s4  ;;  %vm282_vm2 = vcmask 31744  }
   0xe   : > { %370 = vmatprep.subr.bf16.mxu0 %v409_v1  ;;  %v400_v7 = vld [vmem:[%s166_s24] sm:$0xff]  }
  0x11   : > { %371 = vmatpush3.bf16.msra.mxu0 %v395_v2 }
  0x12   : > { %372 = vmatprep.subr.bf16.mxu0 %v409_v1 }
  0x15   : > { %373 = vmatpush3.bf16.msra.mxu0 %v396_v3 }
  0x16   : > { %374 = vmatprep.subr.bf16.mxu0 %v409_v1 }
  0x19   : > { %375 = vmatpush3.bf16.msra.mxu0 %v397_v4 }
  0x1a   : > { %376 = vmatprep.subr.bf16.mxu0 %v409_v1 }
  0x1d   : > { %377 = vmatpush3.bf16.msra.mxu0 %v398_v5 }
  0x1e   : > { %378 = vmatprep.subr.bf16.mxu0 %v409_v1 }
  0x21   : > { %379 = vmatpush3.bf16.msra.mxu0 %v399_v6 }
  0x24   : > { %381 = vmatmul.mubr.msk.bf16.vlgmr.msra.gmra.mxu0 %vm237_vm1, %v400_v7 }
  0xe4   : > { %v275_v9 = vpop.f32.mrf.mxu0 }
  0xe5   : > { %v276_v10 = vadd.f32 %v350_v8, %v275_v9 }
  0xe6   : > { %v382_v11 = vpop.f32.mrf.mxu0 }
  0xe7   : > { %283 = vst.msk [vmem:[%s172_s9] sm:$0xff] %vm282_vm2, %v276_v10 }
  0xe8   : > { %v278_v12 = vpop.f32.mrf.mxu0 }
  0xe9   : > { %v279_v13 = vadd.f32 %v350_v8, %v278_v12 }
  0xea   : > { %v383_v14 = vpop.f32.mrf.mxu0 }
  0xeb   : > { %284 = vst.msk [vmem:[%s172_s9 + $0x8] sm:$0xff] %vm282_vm2, %v279_v13 }
  0xec PF: > { %s13_s12 = sadd.s32 1, %s407_s12  }
  0xed   : > { %p10_p4 = scmp.ge.s32.totalorder %s13_s12, 4  }
  0xef   :  { %12 = sbr.rel (!%p10_p4) target bundleno = 1 (0x1), region = 62 }

// kernel: autoformer_forward.33
= control target key start
LH: loop header
LB: loop body
LE: loop exit
PB: predicated region body
PF: predicated region fallthrough
CT: control target
= control target key end

     0   :  { %s624_s18 = smov 0   ;;  %s670_s0 = inlined_call_operand.vmem [shape: f32[2,16,32], index: 0, kind: input, shape index: {}]   ;;  %s671_s1 = inlined_call_operand.vmem [shape: bf16[32,32], index: 1, kind: input, shape index: {}]   ;;  %s672_s2 = inlined_call_operand.vmem [shape: bf16[32,32], index: 2, kind: input, shape index: {}]   ;;  %s673_s3 = inlined_call_operand.vmem [shape: bf16[16,16], index: 3, kind: input, shape index: {}]   ;;  %s674_s4 = inlined_call_operand.vmem [shape: f32[2,16,32], index: 4, kind: output, shape index: {0}]   ;;  %s675_s5 = inlined_call_operand.vmem [shape: f32[2,16,32], index: 5, kind: output, shape index: {1}]  }
   0x1 LB: > { %s515_s19 = sadd.s32 4294967295, %s590_s18   ;;  %p519_p0 = scmp.ge.s32.totalorder %s590_s18, 1  ;;  %s590_s18 = sphi %s624_s18, %s16_s18  }
   0x2   : > { %p190_p1 = scmp.lt.s32.totalorder %s590_s18, 3 }
   0x4   : > { %p191_p2 = pnand %p519_p0, %p190_p1 }
   0x5   : > { %p223_p3 = scmp.lt.s32.totalorder (!%p191_p2), %s515_s19, 1 }
   0x6   : > { %194 = sbr.rel (%p191_p2) target bundleno = 625 (0x271), region = 36 }
   0xb   : > { %v579_v0 = vld [vmem:[%s671_s1 + $0x8] sm:$0xff]   ;;  %v592_v1 = vmov 0.0   ;;  %v580_v2 = vld [vmem:[%s671_s1] sm:$0xff]   ;;  %vm593_vm0 = vmmov 0   ;;  %s677_s19 = smov (!%p223_p3, %s515_s19), 1  ;;  %vm258_vm1 = vcmask 261120  }
   0xc   : > { %547 = vmatprep.subr.bf16.mxu0 %v592_v1  ;;  %555 = vmatprep.subr.bf16.mxu1 %v592_v1  ;;  %s638_s24 = sshll.u32 %s677_s19, 4  ;;  %v581_v6 = vld [vmem:[%s672_s2 + $0x8] sm:$0xff]   ;;  %v582_v7 = vld [vmem:[%s672_s2] sm:$0xff]   ;;  %vm376_vm2 = vcmask 130048  }
   0xd   : > { %548 = vmatpush3.bf16.msra.mxu0 %v579_v0  ;;  %551 = vmatprep.mubr.msk.bf16.mxu0 %vm593_vm0, %v592_v1  ;;  %s227_s27 = scalar_lea.vmem %s670_s0, %s638_s24  ;;  %v583_v22 = vld [vmem:[%s673_s3] sm:$0xff]   ;;  %s237_s11 = scalar_lea.vmem %s675_s5, %s638_s24 }
   0xe   : > { %549 = vmatprep.subr.bf16.mxu0 %v592_v1  ;;  %559 = vmatprep.mubr.msk.bf16.mxu1 %vm593_vm0, %v592_v1  ;;  %v239_v3 = vld [vmem:[%s227_s27] sm:$0xff]  ;;  %v240_v4 = vld [vmem:[%s227_s27 + $0x8] sm:$0xff]  ;;  %s232_s14 = scalar_lea.vmem %s674_s4, %s638_s24 }
   0xf   : > { %v241_v5 = vpack.c.bf16 %v240_v4, %v239_v3  ;;  %556 = vmatpush3.bf16.msra.mxu1 %v581_v6 }
  0x10   : > { %557 = vmatprep.subr.bf16.mxu1 %v592_v1 }
  0x11   : > { %550 = vmatpush3.bf16.msra.mxu0 %v580_v2 }
  0x12   : > { %563 = vmatprep.subr.bf16.mxu0 %v592_v1 }
  0x13   : > { %558 = vmatpush3.bf16.msra.mxu1 %v582_v7 }
  0x14   : > { %552 = vmatmul.mubr.msk.bf16.vlgmr.msra.gmra.mxu0 %vm258_vm1, %v241_v5 }
  0x15   : > { %565 = vmatprep.mubr.msk.bf16.mxu0 %vm593_vm0, %v592_v1 }
  0xd4   : > { %v296_v8 = vpop.f32.mrf.mxu0 }
  0xd5   : > { %v303_v11 = vmax.f32 %v296_v8, 0.0 }
  0xd6   : > { %v553_v9 = vpop.f32.mrf.mxu0 }
  0xd8   : > { %v299_v10 = vpop.f32.mrf.mxu0 }
  0xd9   : > { %v304_v12 = vmax.f32 %v299_v10, 0.0 }
  0xda   : > { %v554_v13 = vpop.f32.mrf.mxu0 }
  0xdb   : > { %v305_v14 = vpack.c.bf16 %v304_v12, %v303_v11 }
  0xdd   : > { %560 = vmatmul.mubr.msk.bf16.vlgmr.msra.gmra.mxu1 %vm258_vm1, %v305_v14 }
 0x19d   : > { %v359_v15 = vpop.f32.mrf.mxu1 }
 0x19e   : > { %v366_v18 = vadd.f32 %v359_v15, %v239_v3 }
 0x19f   : > { %v561_v16 = vpop.f32.mrf.mxu1 }
 0x1a1   : > { %v362_v17 = vpop.f32.mrf.mxu1 }
 0x1a2   : > { %v367_v19 = vadd.f32 %v362_v17, %v240_v4 }
 0x1a3   : > { %v562_v20 = vpop.f32.mrf.mxu1 }
 0x1a4   : > { %v370_v21 = vpack.c.bf16 %v367_v19, %v366_v18 }
 0x1a6   : > { %564 = vmatpush3.bf16.msra.mxu0 %v370_v21 }
 0x1a9   : > { %566 = vmatmul.mubr.msk.bf16.vlgmr.msra.gmra.mxu0 %vm376_vm2, %v583_v22 }
 0x269   : > { %v414_v23 = vpop.f32.mrf.mxu0 }
 0x26a   : > { %v421_v24 = vsub.f32 %v366_v18, %v414_v23  ;;  %425 = vst.msk [vmem:[%s237_s11] sm:$0xff] %vm258_vm1, %v414_v23 }
 0x26b   : > { %v567_v25 = vpop.f32.mrf.mxu0 }
 0x26c   : > { %423 = vst.msk [vmem:[%s232_s14] sm:$0xff] %vm258_vm1, %v421_v24 }
 0x26d   : > { %v417_v26 = vpop.f32.mrf.mxu0 }
 0x26e   : > { %v422_v27 = vsub.f32 %v367_v19, %v417_v26  ;;  %426 = vst.msk [vmem:[%s237_s11 + $0x8] sm:$0xff] %vm258_vm1, %v417_v26 }
 0x26f   : > { %v568_v28 = vpop.f32.mrf.mxu0 }
 0x270   : > { %424 = vst.msk [vmem:[%s232_s14 + $0x8] sm:$0xff] %vm258_vm1, %v422_v27 }
 0x271 PF: > { %s16_s18 = sadd.s32 1, %s590_s18  }
 0x272   : > { %p13_p4 = scmp.ge.s32.totalorder %s16_s18, 4  }
 0x274   :  { %15 = sbr.rel (!%p13_p4) target bundleno = 1 (0x1), region = 78 }

// kernel: autoformer_forward.35
= control target key start
LH: loop header
LB: loop body
LE: loop exit
PB: predicated region body
PF: predicated region fallthrough
CT: control target
= control target key end

     0   :  { %s570_s21 = smov 0   ;;  %s617_s0 = inlined_call_operand.vmem [shape: f32[2,16,32], index: 0, kind: input, shape index: {}]   ;;  %s618_s1 = inlined_call_operand.vmem [shape: f32[1,32], index: 1, kind: input, shape index: {}]   ;;  %s619_s2 = inlined_call_operand.vmem [shape: f32[1,32], index: 2, kind: input, shape index: {}]   ;;  %s620_s3 = inlined_call_operand.vmem [shape: bf16[32,4], index: 3, kind: input, shape index: {}]   ;;  %s621_s4 = inlined_call_operand.vmem [shape: f32[1,4], index: 4, kind: input, shape index: {}]   ;;  %s622_s5 = inlined_call_operand.vmem [shape: f32[2,16,4], index: 5, kind: input, shape index: {}]   ;;  %s623_s6 = inlined_call_operand.vmem [shape: f32[2,16,4], index: 6, kind: output, shape index: {}]  }
   0x1 LB: > { %s476_s22 = sadd.s32 4294967295, %s531_s21   ;;  %p480_p0 = scmp.ge.s32.totalorder %s531_s21, 1  ;;  %s531_s21 = sphi %s570_s21, %s16_s21  }
   0x2   : > { %p222_p1 = scmp.lt.s32.totalorder %s531_s21, 3 }
   0x4   : > { %p223_p2 = pnand %p480_p0, %p222_p1 }
   0x5   : > { %p257_p3 = scmp.lt.s32.totalorder (!%p223_p2), %s476_s22, 1 }
   0x6   : > { %226 = sbr.rel (%p223_p2) target bundleno = 550 (0x226), region = 44 }
   0xb   : > { %s625_s22 = smov (!%p257_p3, %s476_s22), 1  ;;  %vm275_vm0 = vcmask 261120   ;;  %v519_v14 = vld [vmem:[%s620_s3 + $0x8] sm:$0xff]   ;;  %v533_v15 = vmov 0.0   ;;  %vm534_vm1 = vmmov 0   ;;  %v520_v16 = vld [vmem:[%s620_s3] sm:$0xff]  }
   0xc   : > { %s578_s23 = sshll.u32 %s625_s22, 4  ;;  %501 = vmatprep.subr.bf16.mxu0 %v533_v15  ;;  %505 = vmatprep.mubr.msk.bf16.mxu0 %vm534_vm1, %v533_v15  ;;  %v487_v24 = vld [vmem:[%s618_s1] ss:$0 sm:$0xff]  ;;  %vm406_vm2 = vcmask 31744  }
   0xd   : > { %s261_s26 = scalar_lea.vmem %s617_s0, %s578_s23  ;;  %502 = vmatpush3.bf16.msra.mxu0 %v519_v14  ;;  %v488_v28 = vld [vmem:[%s619_s2] ss:$0 sm:$0xff]  ;;  %s266_s13 = scalar_lea.vmem %s622_s5, %s578_s23 }
   0xe   : > { %v273_v0 = vld [vmem:[%s261_s26] sm:$0xff]  ;;  %v274_v1 = vld [vmem:[%s261_s26 + $0x8] sm:$0xff]  ;;  %503 = vmatprep.subr.bf16.mxu0 %v533_v15  ;;  %s271_s18 = scalar_lea.vmem %s623_s6, %s578_s23 }
   0xf   : > { %v276_v2 = vsel %vm275_vm0, %v273_v0, 0.0  ;;  %v279_v3 = vsel %vm275_vm0, %v274_v1, 0.0  ;;  %v489_v46 = vld [vmem:[%s621_s4] ss:$0 sm:$0xff]  ;;  %v403_v53 = vld [vmem:[%s266_s13 + $0x8] sm:$0xff] }
  0x10   : > { %277 = vadd.xlane.f32.xlu0 %v276_v2  ;;  %v402_v48 = vld [vmem:[%s266_s13] sm:$0xff] }
  0x11   : > { %504 = vmatpush3.bf16.msra.mxu0 %v520_v16 }
  0x14   : > { %280 = vadd.xlane.f32.xlu0 %v279_v3 }
  0x99   : > { %v278_v4 = vpop.xlane.xlu0 %277 }
  0x9a   : > { %v283_v5 = vmul.f32 0.03125, %v278_v4 }
  0x9c   : > { %v285_v6 = vsub.f32 %v273_v0, %v283_v5 }
  0x9d   : > { %v281_v7 = vpop.xlane.xlu0 %280 }
  0x9e   : > { %v284_v8 = vmul.f32 0.03125, %v281_v7  ;;  %v287_v9 = vmul.f32 %v285_v6, %v285_v6 }
  0xa0   : > { %v286_v10 = vsub.f32 %v274_v1, %v284_v8  ;;  %v289_v11 = vsel %vm275_vm0, %v287_v9, 0.0 }
  0xa1   : > { %290 = vadd.xlane.f32.xlu1 %v289_v11 }
  0xa2   : > { %v288_v12 = vmul.f32 %v286_v10, %v286_v10 }
  0xa4   : > { %v292_v13 = vsel %vm275_vm0, %v288_v12, 0.0 }
  0xa5   : > { %293 = vadd.xlane.f32.xlu1 %v292_v13 }
 0x12a   : > { %v291_v17 = vpop.xlane.xlu1 %290 }
 0x12b   : > { %v295_v18 = vmul.f32 0.03125, %v291_v17 }
 0x12d   : > { %v297_v19 = vadd.f32 1e-05, %v295_v18 }
 0x12e   : > { %v294_v20 = vpop.xlane.xlu1 %293 }
 0x12f   : > { %521 = vrsqrt.f32 %v297_v19  ;;  %v296_v21 = vmul.f32 0.03125, %v294_v20 }
 0x131   : > { %v298_v22 = vadd.f32 1e-05, %v296_v21 }
 0x133   : > { %523 = vrsqrt.f32 %v298_v22 }
 0x13c   : > { %v522_v23 = vpop.eup %521 }
 0x13d   : > { %v301_v25 = vmul.f32 %v522_v23, %v285_v6 }
 0x13f   : > { %v310_v26 = vmul.f32 %v487_v24, %v301_v25 }
 0x140   : > { %v524_v27 = vpop.eup %523 }
 0x141   : > { %v302_v29 = vmul.f32 %v524_v27, %v286_v10  ;;  %v319_v31 = vadd.f32 %v488_v28, %v310_v26 }
 0x143   : > { %v311_v30 = vmul.f32 %v487_v24, %v302_v29  ;;  %v321_v33 = vsel %vm275_vm0, %v319_v31, 0.0 }
 0x145   : > { %v320_v32 = vadd.f32 %v488_v28, %v311_v30 }
 0x147   : > { %v322_v34 = vsel %vm275_vm0, %v320_v32, 0.0 }
 0x148   : > { %v323_v35 = vadd.f32 %v322_v34, %v321_v33 }
 0x14a   : > { %v324_v36 = vrot.slane %v323_v35, 4 }
 0x14c   : > { %v325_v37 = vadd.f32 %v324_v36, %v323_v35 }
 0x14e   : > { %v326_v38 = vrot.slane %v325_v37, 2 }
 0x150   : > { %v327_v39 = vadd.f32 %v326_v38, %v325_v37 }
 0x152   : > { %v328_v40 = vrot.slane %v327_v39, 1 }
 0x154   : > { %v329_v41 = vadd.f32 %v328_v40, %v327_v39 }
 0x156   : > { %v331_v42 = vmul.f32 0.0625, %v329_v41 }
 0x158   : > { %v332_v43 = vsub.f32 %v319_v31, %v331_v42  ;;  %v333_v44 = vsub.f32 %v320_v32, %v331_v42 }
 0x15a   : > { %v334_v45 = vpack.c.bf16 %v333_v44, %v332_v43 }
 0x15c   : > { %506 = vmatmul.mubr.msk.bf16.vlgmr.msra.gmra.mxu0 %vm275_vm0, %v334_v45 }
 0x21c   : > { %v395_v47 = vpop.f32.mrf.mxu0 }
 0x21d   : > { %v396_v49 = vadd.f32 %v489_v46, %v395_v47 }
 0x21e   : > { %v507_v50 = vpop.f32.mrf.mxu0 }
 0x21f   : > { %v404_v51 = vadd.f32 %v402_v48, %v396_v49 }
 0x220   : > { %v398_v52 = vpop.f32.mrf.mxu0 }
 0x221   : > { %407 = vst.msk [vmem:[%s271_s18] sm:$0xff] %vm406_vm2, %v404_v51  ;;  %v399_v54 = vadd.f32 %v489_v46, %v398_v52 }
 0x222   : > { %v508_v55 = vpop.f32.mrf.mxu0 }
 0x223   : > { %v405_v56 = vadd.f32 %v403_v53, %v399_v54 }
 0x225   : > { %408 = vst.msk [vmem:[%s271_s18 + $0x8] sm:$0xff] %vm406_vm2, %v405_v56 }
 0x226 PF: > { %s16_s21 = sadd.s32 1, %s531_s21  }
 0x227   : > { %p13_p4 = scmp.ge.s32.totalorder %s16_s21, 4  }
 0x229   :  { %15 = sbr.rel (!%p13_p4) target bundleno = 1 (0x1), region = 77 }

</bundles_post_ra>
